<compile_context>
chip_gen: v6e
topology: v6e:2x2x1
jax: 0.10.0
libtpu: 0.0.40
codegen_flags: <defaults>
</compile_context>

<pallas_src>
import functools

import jax
import jax.numpy as jnp
import numpy as np
from jax import lax
from jax.experimental import pallas as pl
from jax.experimental.pallas import tpu as pltpu


def _conv_lrelu_kernel(x_ref, w_ref, b_ref, o_ref, *, khs, kws, stride, oh, ow,
                       negative_slope):
    # x_ref: (1, s*s, C, Hq, Wq) f32   phase-decomposed padded input, one batch
    # w_ref: (KH, KW, OC, C)     f32
    # b_ref: (OC, 1)             f32
    # o_ref: (1, OC, OH*OW)      f32
    c = x_ref.shape[2]
    m = oh * ow
    acc = None
    for i in range(khs):          # static unroll over kernel taps
        for j in range(kws):
            ph, qh = i % stride, i // stride
            pw, qw = j % stride, j // stride
            # statically shifted window of the VMEM-resident tile
            x_tap = x_ref[0, ph * stride + pw, :, qh:qh + oh, qw:qw + ow]
            x_tap = x_tap.reshape(c, m)                       # (C, OH*OW)
            w_tap = w_ref[i, j]                               # (OC, C)
            part = jnp.dot(w_tap, x_tap,
                           preferred_element_type=jnp.float32,
                           precision=lax.Precision.HIGHEST)
            acc = part if acc is None else acc + part
    y = acc + b_ref[...]                                      # (OC, M) + (OC, 1)
    o_ref[0] = jnp.where(y >= 0, y, negative_slope * y).astype(o_ref.dtype)


def _round_up(x, m):
    return ((x + m - 1) // m) * m


def _block_vmem_bytes(shape, itemsize=4):
    """Approximate VMEM footprint of one block, with (8, 128) layout padding."""
    s = list(shape)
    s[-1] = _round_up(s[-1], 128)
    if len(s) >= 2:
        s[-2] = _round_up(s[-2], 8)
    return int(np.prod(s)) * itemsize


def _pick_vmem_limit(need_bytes):
    """Generation-aware scoped-VMEM limit (v7x has 64 MiB, v5e/v6e 128 MiB)."""
    try:
        phys = int(pltpu.get_tpu_info().vmem_capacity_bytes)
    except Exception:
        phys = 64 * 1024 * 1024            # conservative: v7x per-TC VMEM
    cap = (phys * 3) // 4                  # headroom for compiler internals
    limit = max(32 * 1024 * 1024, need_bytes + (8 << 20))
    return min(limit, cap)


def conv_block_forward(x, weight, bias, *, stride, padding, negative_slope):
    """Conv2d(in->out, k, stride, padding) + LeakyReLU.  NCHW in / NCHW out."""
    N, C, H, W = x.shape
    OC, _, KH, KW = weight.shape
    s = int(stride)
    p = int(padding)
    OH = (H + 2 * p - KH) // s + 1
    OW = (W + 2 * p - KW) // s + 1
    M = OH * OW

    # ---- pad; for stride > 1 phase-decompose (same total size, no KH*KW blowup)
    xp = jnp.pad(x, ((0, 0), (0, 0), (p, p), (p, p))).astype(jnp.float32)
    HP, WP = H + 2 * p, W + 2 * p
    if s == 1:
        Hq, Wq = HP, WP
        x_r = xp.reshape(N, 1, C, HP, WP)
    else:
        Hqs, Wqs = _round_up(HP, s), _round_up(WP, s)
        xp = jnp.pad(xp, ((0, 0), (0, 0), (0, Hqs - HP), (0, Wqs - WP)))
        Hq, Wq = Hqs // s, Wqs // s
        # x_r[n, ph*s+pw, c, hq, wq] == xp[n, c, hq*s+ph, wq*s+pw]
        x_r = (xp.reshape(N, C, Hq, s, Wq, s)
                 .transpose(0, 3, 5, 1, 2, 4)
                 .reshape(N, s * s, C, Hq, Wq))

    w_r = jnp.transpose(weight, (2, 3, 0, 1)).astype(jnp.float32)  # (KH,KW,OC,C)
    b_r = bias.reshape(OC, 1).astype(jnp.float32)

    kernel = functools.partial(
        _conv_lrelu_kernel, khs=KH, kws=KW, stride=s, oh=OH, ow=OW,
        negative_slope=float(negative_slope))

    # ---- VMEM budget: 2x (double-buffered) input + output blocks + params.
    # TODO(synk): for very large images (per-batch block exceeding VMEM) a
    # row-band pipeline with manual make_async_copy DMAs would be needed.
    need = (2 * _block_vmem_bytes((s * s * C, Hq, Wq))
            + 2 * _block_vmem_bytes((OC, M))
            + _block_vmem_bytes((KH * KW, OC, C))
            + _block_vmem_bytes((OC, 1)))
    vmem_limit = _pick_vmem_limit(need)

    cost = pl.CostEstimate(
        flops=2 * N * OC * M * C * KH * KW,
        transcendentals=0,
        bytes_accessed=(int(x_r.size) + int(w_r.size) + int(b_r.size)
                        + N * OC * M) * 4,
    )

    out = pl.pallas_call(
        kernel,
        out_shape=jax.ShapeDtypeStruct((N, OC, M), jnp.float32),
        grid=(N,),
        in_specs=[
            pl.BlockSpec((1, s * s, C, Hq, Wq), lambda n: (n, 0, 0, 0, 0)),
            pl.BlockSpec((KH, KW, OC, C), lambda n: (0, 0, 0, 0)),
            pl.BlockSpec((OC, 1), lambda n: (0, 0)),
        ],
        out_specs=pl.BlockSpec((1, OC, M), lambda n: (n, 0, 0)),
        compiler_params=pltpu.CompilerParams(
            dimension_semantics=("parallel",),
            vmem_limit_bytes=vmem_limit,
        ),
        cost_estimate=cost,
    )(x_r, w_r, b_r)

    # (N, OC, OH*OW) -> NCHW: contiguous split of the last dim, free (no copy).
    return out.reshape(N, OC, OH, OW)


def _reference(x, weight, bias, *, stride, padding, negative_slope):
    y = lax.conv_general_dilated(
        x, weight,
        window_strides=(stride, stride),
        padding=[(padding, padding), (padding, padding)],
        dimension_numbers=("NCHW", "OIHW", "NCHW"),
        precision=lax.Precision.HIGHEST)
    y = y + bias.reshape(1, -1, 1, 1)
    return jnp.where(y >= 0, y, negative_slope * y)


if __name__ == "__main__":
    # ConvBlock(dims=2, in_channels=4, out_channels=8, kernel_size=3,
    #           stride=1, padding=1, negative_slope=0.1)
    N, C, H, W = 2, 4, 16, 16
    OC, KH, KW = 8, 3, 3
    negative_slope = 0.1

    key = jax.random.PRNGKey(0)
    kx, kw, kb = jax.random.split(key, 3)
    x = jax.random.normal(kx, (N, C, H, W), dtype=jnp.float32)
    fan_in = C * KH * KW
    bound = 1.0 / np.sqrt(fan_in)
    weight = jax.random.uniform(kw, (OC, C, KH, KW), jnp.float32, -bound, bound)
    bias = jax.random.uniform(kb, (OC,), jnp.float32, -bound, bound)

    ok = True
    for stride, padding in [(1, 1), (2, 1)]:   # demo config + strided sanity check
        fwd = jax.jit(functools.partial(
            conv_block_forward, stride=stride, padding=padding,
            negative_slope=negative_slope))
        out = jax.block_until_ready(fwd(x, weight, bias))
        ref = _reference(x, weight, bias, stride=stride, padding=padding,
                         negative_slope=negative_slope)
        np.testing.assert_allclose(np.asarray(out), np.asarray(ref),
                                   rtol=1e-4, atol=1e-5)
        ok = ok and out.shape == ref.shape

    if ok:
        print("KERNEL_OK")
</pallas_src>

<mosaic_0001>
module attributes {stable_mosaic.version = 11 : i64} {
  func.func @_conv_lrelu_kernel(%arg0: i32, %arg1: memref<1x1x4x18x18xf32, #tpu.memory_space<vmem>>, %arg2: memref<3x3x8x4xf32, #tpu.memory_space<vmem>>, %arg3: memref<8x1xf32, #tpu.memory_space<vmem>>, %arg4: memref<1x8x256xf32, #tpu.memory_space<vmem>>) attributes {dimension_semantics = [#tpu.dimension_semantics<parallel>], iteration_bounds = array<i64: 2>, scalar_prefetch = 0 : i64, scratch_operands = 0 : i64, tpu.core_type = #tpu.core_type<tc>, window_params = [{transform_indices = @transform_0, window_bounds = array<i64: 1, 1, 4, 18, 18>}, {pipeline_mode = #tpu.pipeline_mode<synchronous>, transform_indices = @transform_1, window_bounds = array<i64: 3, 3, 8, 4>}, {pipeline_mode = #tpu.pipeline_mode<synchronous>, transform_indices = @transform_2, window_bounds = array<i64: 8, 1>}, {transform_indices = @transform_3, window_bounds = array<i64: 1, 8, 256>}]} {
    %c0 = arith.constant 0 : index
    %c0_0 = arith.constant 0 : index
    %c0_1 = arith.constant 0 : index
    %c0_2 = arith.constant 0 : index
    %c0_3 = arith.constant 0 : index
    %0 = vector.load %arg1[%c0, %c0_0, %c0_1, %c0_2, %c0_3] : memref<1x1x4x18x18xf32, #tpu.memory_space<vmem>>, vector<1x1x4x16x16xf32>
    %1 = vector.shape_cast %0 : vector<1x1x4x16x16xf32> to vector<4x16x16xf32>
    %2 = vector.shape_cast %1 : vector<4x16x16xf32> to vector<4x256xf32>
    %c0_4 = arith.constant 0 : index
    %c0_5 = arith.constant 0 : index
    %c0_6 = arith.constant 0 : index
    %c0_7 = arith.constant 0 : index
    %3 = vector.load %arg2[%c0_4, %c0_5, %c0_6, %c0_7] : memref<3x3x8x4xf32, #tpu.memory_space<vmem>>, vector<1x1x8x4xf32>
    %4 = vector.shape_cast %3 : vector<1x1x8x4xf32> to vector<8x4xf32>
    %cst = arith.constant dense<0.000000e+00> : vector<8x256xf32>
    %5 = tpu.matmul %4, %2, %cst {dimension_numbers = #tpu.dot_dimension_numbers<[1], [0], [0], [1], [0, 0, 1, 1], [], []>, precision = #tpu.contract_precision<fp32>} : vector<8x4xf32>, vector<4x256xf32>, vector<8x256xf32> -> vector<8x256xf32>
    %c0_8 = arith.constant 0 : index
    %c0_9 = arith.constant 0 : index
    %c0_10 = arith.constant 0 : index
    %c0_11 = arith.constant 0 : index
    %c1 = arith.constant 1 : index
    %6 = vector.load %arg1[%c0_8, %c0_9, %c0_10, %c0_11, %c1] : memref<1x1x4x18x18xf32, #tpu.memory_space<vmem>>, vector<1x1x4x16x16xf32>
    %7 = vector.shape_cast %6 : vector<1x1x4x16x16xf32> to vector<4x16x16xf32>
    %8 = vector.shape_cast %7 : vector<4x16x16xf32> to vector<4x256xf32>
    %c0_12 = arith.constant 0 : index
    %c1_13 = arith.constant 1 : index
    %c0_14 = arith.constant 0 : index
    %c0_15 = arith.constant 0 : index
    %9 = vector.load %arg2[%c0_12, %c1_13, %c0_14, %c0_15] : memref<3x3x8x4xf32, #tpu.memory_space<vmem>>, vector<1x1x8x4xf32>
    %10 = vector.shape_cast %9 : vector<1x1x8x4xf32> to vector<8x4xf32>
    %cst_16 = arith.constant dense<0.000000e+00> : vector<8x256xf32>
    %11 = tpu.matmul %10, %8, %cst_16 {dimension_numbers = #tpu.dot_dimension_numbers<[1], [0], [0], [1], [0, 0, 1, 1], [], []>, precision = #tpu.contract_precision<fp32>} : vector<8x4xf32>, vector<4x256xf32>, vector<8x256xf32> -> vector<8x256xf32>
    %12 = arith.addf %5, %11 : vector<8x256xf32>
    %c0_17 = arith.constant 0 : index
    %c0_18 = arith.constant 0 : index
    %c0_19 = arith.constant 0 : index
    %c0_20 = arith.constant 0 : index
    %c2 = arith.constant 2 : index
    %13 = vector.load %arg1[%c0_17, %c0_18, %c0_19, %c0_20, %c2] : memref<1x1x4x18x18xf32, #tpu.memory_space<vmem>>, vector<1x1x4x16x16xf32>
    %14 = vector.shape_cast %13 : vector<1x1x4x16x16xf32> to vector<4x16x16xf32>
    %15 = vector.shape_cast %14 : vector<4x16x16xf32> to vector<4x256xf32>
    %c0_21 = arith.constant 0 : index
    %c2_22 = arith.constant 2 : index
    %c0_23 = arith.constant 0 : index
    %c0_24 = arith.constant 0 : index
    %16 = vector.load %arg2[%c0_21, %c2_22, %c0_23, %c0_24] : memref<3x3x8x4xf32, #tpu.memory_space<vmem>>, vector<1x1x8x4xf32>
    %17 = vector.shape_cast %16 : vector<1x1x8x4xf32> to vector<8x4xf32>
    %cst_25 = arith.constant dense<0.000000e+00> : vector<8x256xf32>
    %18 = tpu.matmul %17, %15, %cst_25 {dimension_numbers = #tpu.dot_dimension_numbers<[1], [0], [0], [1], [0, 0, 1, 1], [], []>, precision = #tpu.contract_precision<fp32>} : vector<8x4xf32>, vector<4x256xf32>, vector<8x256xf32> -> vector<8x256xf32>
    %19 = arith.addf %12, %18 : vector<8x256xf32>
    %c0_26 = arith.constant 0 : index
    %c0_27 = arith.constant 0 : index
    %c0_28 = arith.constant 0 : index
    %c1_29 = arith.constant 1 : index
    %c0_30 = arith.constant 0 : index
    %20 = vector.load %arg1[%c0_26, %c0_27, %c0_28, %c1_29, %c0_30] : memref<1x1x4x18x18xf32, #tpu.memory_space<vmem>>, vector<1x1x4x16x16xf32>
    %21 = vector.shape_cast %20 : vector<1x1x4x16x16xf32> to vector<4x16x16xf32>
    %22 = vector.shape_cast %21 : vector<4x16x16xf32> to vector<4x256xf32>
    %c1_31 = arith.constant 1 : index
    %c0_32 = arith.constant 0 : index
    %c0_33 = arith.constant 0 : index
    %c0_34 = arith.constant 0 : index
    %23 = vector.load %arg2[%c1_31, %c0_32, %c0_33, %c0_34] : memref<3x3x8x4xf32, #tpu.memory_space<vmem>>, vector<1x1x8x4xf32>
    %24 = vector.shape_cast %23 : vector<1x1x8x4xf32> to vector<8x4xf32>
    %cst_35 = arith.constant dense<0.000000e+00> : vector<8x256xf32>
    %25 = tpu.matmul %24, %22, %cst_35 {dimension_numbers = #tpu.dot_dimension_numbers<[1], [0], [0], [1], [0, 0, 1, 1], [], []>, precision = #tpu.contract_precision<fp32>} : vector<8x4xf32>, vector<4x256xf32>, vector<8x256xf32> -> vector<8x256xf32>
    %26 = arith.addf %19, %25 : vector<8x256xf32>
    %c0_36 = arith.constant 0 : index
    %c0_37 = arith.constant 0 : index
    %c0_38 = arith.constant 0 : index
    %c1_39 = arith.constant 1 : index
    %c1_40 = arith.constant 1 : index
    %27 = vector.load %arg1[%c0_36, %c0_37, %c0_38, %c1_39, %c1_40] : memref<1x1x4x18x18xf32, #tpu.memory_space<vmem>>, vector<1x1x4x16x16xf32>
    %28 = vector.shape_cast %27 : vector<1x1x4x16x16xf32> to vector<4x16x16xf32>
    %29 = vector.shape_cast %28 : vector<4x16x16xf32> to vector<4x256xf32>
    %c1_41 = arith.constant 1 : index
    %c1_42 = arith.constant 1 : index
    %c0_43 = arith.constant 0 : index
    %c0_44 = arith.constant 0 : index
    %30 = vector.load %arg2[%c1_41, %c1_42, %c0_43, %c0_44] : memref<3x3x8x4xf32, #tpu.memory_space<vmem>>, vector<1x1x8x4xf32>
    %31 = vector.shape_cast %30 : vector<1x1x8x4xf32> to vector<8x4xf32>
    %cst_45 = arith.constant dense<0.000000e+00> : vector<8x256xf32>
    %32 = tpu.matmul %31, %29, %cst_45 {dimension_numbers = #tpu.dot_dimension_numbers<[1], [0], [0], [1], [0, 0, 1, 1], [], []>, precision = #tpu.contract_precision<fp32>} : vector<8x4xf32>, vector<4x256xf32>, vector<8x256xf32> -> vector<8x256xf32>
    %33 = arith.addf %26, %32 : vector<8x256xf32>
    %c0_46 = arith.constant 0 : index
    %c0_47 = arith.constant 0 : index
    %c0_48 = arith.constant 0 : index
    %c1_49 = arith.constant 1 : index
    %c2_50 = arith.constant 2 : index
    %34 = vector.load %arg1[%c0_46, %c0_47, %c0_48, %c1_49, %c2_50] : memref<1x1x4x18x18xf32, #tpu.memory_space<vmem>>, vector<1x1x4x16x16xf32>
    %35 = vector.shape_cast %34 : vector<1x1x4x16x16xf32> to vector<4x16x16xf32>
    %36 = vector.shape_cast %35 : vector<4x16x16xf32> to vector<4x256xf32>
    %c1_51 = arith.constant 1 : index
    %c2_52 = arith.constant 2 : index
    %c0_53 = arith.constant 0 : index
    %c0_54 = arith.constant 0 : index
    %37 = vector.load %arg2[%c1_51, %c2_52, %c0_53, %c0_54] : memref<3x3x8x4xf32, #tpu.memory_space<vmem>>, vector<1x1x8x4xf32>
    %38 = vector.shape_cast %37 : vector<1x1x8x4xf32> to vector<8x4xf32>
    %cst_55 = arith.constant dense<0.000000e+00> : vector<8x256xf32>
    %39 = tpu.matmul %38, %36, %cst_55 {dimension_numbers = #tpu.dot_dimension_numbers<[1], [0], [0], [1], [0, 0, 1, 1], [], []>, precision = #tpu.contract_precision<fp32>} : vector<8x4xf32>, vector<4x256xf32>, vector<8x256xf32> -> vector<8x256xf32>
    %40 = arith.addf %33, %39 : vector<8x256xf32>
    %c0_56 = arith.constant 0 : index
    %c0_57 = arith.constant 0 : index
    %c0_58 = arith.constant 0 : index
    %c2_59 = arith.constant 2 : index
    %c0_60 = arith.constant 0 : index
    %41 = vector.load %arg1[%c0_56, %c0_57, %c0_58, %c2_59, %c0_60] : memref<1x1x4x18x18xf32, #tpu.memory_space<vmem>>, vector<1x1x4x16x16xf32>
    %42 = vector.shape_cast %41 : vector<1x1x4x16x16xf32> to vector<4x16x16xf32>
    %43 = vector.shape_cast %42 : vector<4x16x16xf32> to vector<4x256xf32>
    %c2_61 = arith.constant 2 : index
    %c0_62 = arith.constant 0 : index
    %c0_63 = arith.constant 0 : index
    %c0_64 = arith.constant 0 : index
    %44 = vector.load %arg2[%c2_61, %c0_62, %c0_63, %c0_64] : memref<3x3x8x4xf32, #tpu.memory_space<vmem>>, vector<1x1x8x4xf32>
    %45 = vector.shape_cast %44 : vector<1x1x8x4xf32> to vector<8x4xf32>
    %cst_65 = arith.constant dense<0.000000e+00> : vector<8x256xf32>
    %46 = tpu.matmul %45, %43, %cst_65 {dimension_numbers = #tpu.dot_dimension_numbers<[1], [0], [0], [1], [0, 0, 1, 1], [], []>, precision = #tpu.contract_precision<fp32>} : vector<8x4xf32>, vector<4x256xf32>, vector<8x256xf32> -> vector<8x256xf32>
    %47 = arith.addf %40, %46 : vector<8x256xf32>
    %c0_66 = arith.constant 0 : index
    %c0_67 = arith.constant 0 : index
    %c0_68 = arith.constant 0 : index
    %c2_69 = arith.constant 2 : index
    %c1_70 = arith.constant 1 : index
    %48 = vector.load %arg1[%c0_66, %c0_67, %c0_68, %c2_69, %c1_70] : memref<1x1x4x18x18xf32, #tpu.memory_space<vmem>>, vector<1x1x4x16x16xf32>
    %49 = vector.shape_cast %48 : vector<1x1x4x16x16xf32> to vector<4x16x16xf32>
    %50 = vector.shape_cast %49 : vector<4x16x16xf32> to vector<4x256xf32>
    %c2_71 = arith.constant 2 : index
    %c1_72 = arith.constant 1 : index
    %c0_73 = arith.constant 0 : index
    %c0_74 = arith.constant 0 : index
    %51 = vector.load %arg2[%c2_71, %c1_72, %c0_73, %c0_74] : memref<3x3x8x4xf32, #tpu.memory_space<vmem>>, vector<1x1x8x4xf32>
    %52 = vector.shape_cast %51 : vector<1x1x8x4xf32> to vector<8x4xf32>
    %cst_75 = arith.constant dense<0.000000e+00> : vector<8x256xf32>
    %53 = tpu.matmul %52, %50, %cst_75 {dimension_numbers = #tpu.dot_dimension_numbers<[1], [0], [0], [1], [0, 0, 1, 1], [], []>, precision = #tpu.contract_precision<fp32>} : vector<8x4xf32>, vector<4x256xf32>, vector<8x256xf32> -> vector<8x256xf32>
    %54 = arith.addf %47, %53 : vector<8x256xf32>
    %c0_76 = arith.constant 0 : index
    %c0_77 = arith.constant 0 : index
    %c0_78 = arith.constant 0 : index
    %c2_79 = arith.constant 2 : index
    %c2_80 = arith.constant 2 : index
    %55 = vector.load %arg1[%c0_76, %c0_77, %c0_78, %c2_79, %c2_80] : memref<1x1x4x18x18xf32, #tpu.memory_space<vmem>>, vector<1x1x4x16x16xf32>
    %56 = vector.shape_cast %55 : vector<1x1x4x16x16xf32> to vector<4x16x16xf32>
    %57 = vector.shape_cast %56 : vector<4x16x16xf32> to vector<4x256xf32>
    %c2_81 = arith.constant 2 : index
    %c2_82 = arith.constant 2 : index
    %c0_83 = arith.constant 0 : index
    %c0_84 = arith.constant 0 : index
    %58 = vector.load %arg2[%c2_81, %c2_82, %c0_83, %c0_84] : memref<3x3x8x4xf32, #tpu.memory_space<vmem>>, vector<1x1x8x4xf32>
    %59 = vector.shape_cast %58 : vector<1x1x8x4xf32> to vector<8x4xf32>
    %cst_85 = arith.constant dense<0.000000e+00> : vector<8x256xf32>
    %60 = tpu.matmul %59, %57, %cst_85 {dimension_numbers = #tpu.dot_dimension_numbers<[1], [0], [0], [1], [0, 0, 1, 1], [], []>, precision = #tpu.contract_precision<fp32>} : vector<8x4xf32>, vector<4x256xf32>, vector<8x256xf32> -> vector<8x256xf32>
    %61 = arith.addf %54, %60 : vector<8x256xf32>
    %c0_86 = arith.constant 0 : index
    %c0_87 = arith.constant 0 : index
    %62 = vector.load %arg3[%c0_86, %c0_87] : memref<8x1xf32, #tpu.memory_space<vmem>>, vector<8x1xf32>
    %63 = vector.broadcast %62 : vector<8x1xf32> to vector<8x256xf32>
    %64 = arith.addf %61, %63 : vector<8x256xf32>
    %cst_88 = arith.constant 0.000000e+00 : f32
    %65 = vector.broadcast %cst_88 : f32 to vector<8x256xf32>
    %66 = arith.cmpf oge, %64, %65 : vector<8x256xf32>
    %cst_89 = arith.constant 1.000000e-01 : f32
    %67 = vector.broadcast %cst_89 : f32 to vector<8x256xf32>
    %68 = arith.mulf %67, %64 : vector<8x256xf32>
    %69 = arith.select %66, %64, %68 : vector<8x256xi1>, vector<8x256xf32>
    %c0_90 = arith.constant 0 : index
    %c0_91 = arith.constant 0 : index
    %c0_92 = arith.constant 0 : index
    %70 = vector.load %arg4[%c0_90, %c0_91, %c0_92] : memref<1x8x256xf32, #tpu.memory_space<vmem>>, vector<1x8x256xf32>
    %71 = vector.shape_cast %70 : vector<1x8x256xf32> to vector<8x256xf32>
    %72 = vector.shape_cast %69 : vector<8x256xf32> to vector<1x8x256xf32>
    tpu.vector_store %arg4[%c0_90, %c0_91, %c0_92], %72 {strides = array<i32>} : memref<1x8x256xf32, #tpu.memory_space<vmem>>, vector<1x8x256xf32>,
    return
  }
  func.func @transform_0(%arg0: i32) -> (i32, i32, i32, i32, i32) {
    %c0_i32 = arith.constant 0 : i32
    %c0_i32_0 = arith.constant 0 : i32
    %c0_i32_1 = arith.constant 0 : i32
    %c0_i32_2 = arith.constant 0 : i32
    %c0_i32_3 = arith.constant 0 : i32
    return %arg0, %c0_i32, %c0_i32_0, %c0_i32_1, %c0_i32_2 : i32, i32, i32, i32, i32
  }
  func.func @transform_1(%arg0: i32) -> (i32, i32, i32, i32) {
    %c0_i32 = arith.constant 0 : i32
    %c0_i32_0 = arith.constant 0 : i32
    %c0_i32_1 = arith.constant 0 : i32
    %c0_i32_2 = arith.constant 0 : i32
    %c0_i32_3 = arith.constant 0 : i32
    return %c0_i32, %c0_i32_0, %c0_i32_1, %c0_i32_2 : i32, i32, i32, i32
  }
  func.func @transform_2(%arg0: i32) -> (i32, i32) {
    %c0_i32 = arith.constant 0 : i32
    %c0_i32_0 = arith.constant 0 : i32
    %c0_i32_1 = arith.constant 0 : i32
    return %c0_i32, %c0_i32_0 : i32, i32
  }
  func.func @transform_3(%arg0: i32) -> (i32, i32, i32) {
    %c0_i32 = arith.constant 0 : i32
    %c0_i32_0 = arith.constant 0 : i32
    %c0_i32_1 = arith.constant 0 : i32
    return %arg0, %c0_i32, %c0_i32_0 : i32, i32, i32
  }
}

</mosaic_0001>

<bundles_post_ra>
// kernel: conv_block_forward.1
= control target key start
LH: loop header
LB: loop body
LE: loop exit
PB: predicated region body
PF: predicated region fallthrough
CT: control target
= control target key end

     0   :  { %s6767_s12 = smov 0   ;;  %s8341_s0 = inlined_call_operand.vmem [shape: f32[2,1,4,18,18], index: 0, kind: input, shape index: {}]   ;;  %s8342_s1 = inlined_call_operand.vmem [shape: f32[3,3,8,4], index: 1, kind: input, shape index: {}]   ;;  %s8343_s2 = inlined_call_operand.vmem [shape: f32[8,1], index: 2, kind: input, shape index: {}]   ;;  %s8344_s3 = inlined_call_operand.vmem [shape: f32[2,8,256], index: 3, kind: output, shape index: {}]  }
   0x1 LB: > { %s6658_s13 = sadd.s32 4294967295, %s6732_s12   ;;  %p6662_p0 = scmp.ge.s32.totalorder %s6732_s12, 1  ;;  %s6732_s12 = sphi %s6767_s12, %s13_s12  }
   0x2   : > { %p137_p1 = scmp.lt.s32.totalorder %s6732_s12, 3 }
   0x4   : > { %p138_p2 = pnand %p6662_p0, %p137_p1 }
   0x6   : > { %141 = sbr.rel (%p138_p2) target bundleno = 733 (0x2dd), region = 32 }
   0xb   : > { %p161_p3 = scmp.lt.s32.totalorder %s6658_s13, 1  ;;  %v184_v0 = vlaneseq  ;;  %v6734_v1 = vmov 1983009808   ;;  %v6735_v3 = vmov 0.0   ;;  %s6736_s18 = smov 127   ;;  %vm371_vm0 = vcmask 130048  }
   0xc   : > { %v182_v2 = vunpack.c.l.s4 %v6734_v1  ;;  %710 = vmatprep.mubr.f32.mxu0 %v6735_v3  ;;  %796 = vmatprep.mubr.f32.mxu1 %v6735_v3  ;;  %s6737_s19 = smov 126   ;;  %v6738_v33 = vmov 1934713408   ;;  %s6739_s20 = smov 16   ;;  %vm633_vm1 = vcmask 31744   ;;  %vm373_vm2 = vcmask 261120  }
   0xd   : > { %s8383_s13 = smov (!%p161_p3, %s6658_s13), 1  ;;  %v6780_v5 = vshrl.u32 %v184_v0, 7  ;;  %v214_v34 = vunpack.c.l.s4 %v6738_v33  ;;  %s6740_s21 = smov 32   ;;  %vm375_vm3 = vcmask 392192   ;;  %vm377_vm4 = vcmask 523264  }
   0xe   : > { %s6677_s14 = smul.u32 96, %s8383_s13  ;;  %v183_v4 = vunpack.c.0.s8 %v182_v2  ;;  %s6741_s22 = smov 48   ;;  %vm379_vm5 = vcmask 654336   ;;  %vm381_vm6 = vcmask 785408   ;;  %vm383_vm7 = vcmask 916480  }
   0xf   : > { %v215_v39 = vunpack.c.0.s8 %v214_v34  ;;  %s6742_s23 = smov 64   ;;  %s6743_s24 = smov 80   ;;  %vm637_vm8 = vcmask 1043456  }
  0x10   : > { %s6785_s17 = scalar_lea.vmem %s8341_s0, %s6677_s14  ;;  %v6791_v8 = vsub.s32 %v183_v4, %v6780_v5  ;;  %s6744_s25 = smov 96  }
  0x11   : > { %v176_v6 = vld [vmem:[%s6785_s17 + $0x38] sm:$0xff]  ;;  %v172_v7 = vld [vmem:[%s6785_s17 + $0x8] sm:$0xff]  ;;  %v178_v10 = vld [vmem:[%s6785_s17 + $0x50] sm:$0xff]  ;;  %v6887_v40 = vsub.s32 %v215_v39, %v6780_v5  ;;  %s6745_s26 = smov 112  }
  0x12   : > { %411 = vrot.lane.b32.xlu1 %v176_v6, %s6736_s18  ;;  %403 = vrot.lane.b32.xlu0 %v172_v7, %s6736_s18  ;;  %v248_v9 = vcombine.high %v172_v7, %v176_v6  ;;  %v174_v11 = vld [vmem:[%s6785_s17 + $0x20] sm:$0xff]  ;;  %v6805_v15 = vld [vmem:[%s6785_s17 + $0x18] sm:$0xff]  ;;  %v247_v29 = vcombine.low %v172_v7, %v176_v6 }
  0x13   : > { %v264_v12 = vcombine.high %v174_v11, %v178_v10  ;;  %v6808_v16 = vld [vmem:[%s6785_s17] sm:$0xff]  ;;  %v177_v19 = vld [vmem:[%s6785_s17 + $0x48] sm:$0xff]  ;;  %v175_v20 = vld [vmem:[%s6785_s17 + $0x30] sm:$0xff]  ;;  %v263_v30 = vcombine.low %v174_v11, %v178_v10 }
  0x14   : > { %v6797_v13 = vrot.slane %v248_v9, %v6791_v8  ;;  %v6833_v21 = vld [vmem:[%s6785_s17 + $0x21] sm:$0xff]  ;;  %v6836_v22 = vld [vmem:[%s6785_s17 + $0x9] sm:$0xff]  ;;  %v6843_v23 = vld [vmem:[%s6785_s17 + $0x51] sm:$0xff]  ;;  %v195_v31 = vcombine.low %v6805_v15, %v177_v19  ;;  %v179_v32 = vcombine.low %v6808_v16, %v175_v20  ;;  %v255_v35 = vrot.slane %v247_v29, %v6791_v8 }
  0x15   : > { %v6800_v14 = vrot.slane %v264_v12, %v6791_v8  ;;  %v6846_v24 = vld [vmem:[%s6785_s17 + $0x39] sm:$0xff]  ;;  %v6856_v26 = vld [vmem:[%s6785_s17 + $0x1] sm:$0xff]  ;;  %v6863_v27 = vld [vmem:[%s6785_s17 + $0x49] sm:$0xff]  ;;  %v271_v36 = vrot.slane %v263_v30, %v6791_v8  ;;  %v196_v45 = vcombine.high %v6805_v15, %v177_v19  ;;  %v180_v46 = vcombine.high %v6808_v16, %v175_v20 }
  0x16   : > { %415 = vrot.lane.b32.xlu1 %v178_v10, %s6736_s18  ;;  %407 = vrot.lane.b32.xlu0 %v174_v11, %s6736_s18  ;;  %v6853_v25 = vld [vmem:[%s6785_s17 + $0x19] sm:$0xff]  ;;  %v6866_v28 = vld [vmem:[%s6785_s17 + $0x31] sm:$0xff]  ;;  %v203_v37 = vrot.slane %v195_v31, %v6791_v8  ;;  %v187_v38 = vrot.slane %v179_v32, %v6791_v8  ;;  %v2383_v51 = vcombine.low %v6836_v22, %v6846_v24 }
  0x17   : > { %v295_v17 = vcombine.low %v6797_v13, %v6800_v14  ;;  %v296_v18 = vcombine.high %v6797_v13, %v6800_v14  ;;  %v279_v41 = vcombine.low %v255_v35, %v271_v36  ;;  %v280_v47 = vcombine.high %v255_v35, %v271_v36  ;;  %v6966_v12 = vld [vmem:[%s6785_s17 + $0xa] sm:$0xff]  ;;  %v6997_v29 = vld [vmem:[%s6785_s17 + $0x52] sm:$0xff]  ;;  %v7025_v33 = vld [vmem:[%s6785_s17 + $0x1a] sm:$0xff] }
  0x18   : > { %v211_v42 = vcombine.low %v187_v38, %v203_v37  ;;  %v212_v50 = vcombine.high %v187_v38, %v203_v37  ;;  %v2399_v52 = vcombine.low %v6833_v21, %v6843_v23  ;;  %v6914_v53 = vrot.slane %v196_v45, %v6791_v8  ;;  %v7028_v13 = vld [vmem:[%s6785_s17 + $0x32] sm:$0xff]  ;;  %v7038_v34 = vld [vmem:[%s6785_s17 + $0x4a] sm:$0xff] }
  0x19   : > { %v6894_v43 = vrot.slane %v279_v41, %v6887_v40  ;;  %v6917_v54 = vrot.slane %v180_v46, %v6791_v8  ;;  %v294_v55 = vrot.slane %v280_v47, %v6887_v40  ;;  %v6924_v57 = vrot.slane %v2383_v51, %v6791_v8 }
  0x1a   : > { %405 = vrot.lane.b32.xlu1 %v6805_v15, %s6736_s18  ;;  %401 = vrot.lane.b32.xlu0 %v6808_v16, %s6736_s18  ;;  %v6897_v44 = vrot.slane %v211_v42, %v6887_v40  ;;  %v226_v56 = vrot.slane %v212_v50, %v6887_v40  ;;  %v6927_v58 = vrot.slane %v2399_v52, %v6791_v8 }
  0x1b   : > { %v311_v48 = vcombine.high %v6894_v43, %v6735_v3  ;;  %v227_v60 = vcombine.low %v6917_v54, %v6914_v53  ;;  %v312_v61 = vcombine.high %v294_v55, %v6735_v3  ;;  %v2315_v63 = vcombine.low %v6856_v26, %v6866_v28 }
  0x1c   : > { %v243_v49 = vcombine.high %v6897_v44, %v6735_v3  ;;  %v2415_v59 = vcombine.low %v6924_v57, %v6927_v58  ;;  %v244_v62 = vcombine.high %v226_v56, %v6735_v3  ;;  %v2331_v0 = vcombine.low %v6853_v25, %v6863_v27 }
  0x1d   : > { %v303_v1 = vrot.slane %v295_v17, %v6887_v40  ;;  %v235_v2 = vrot.slane %v227_v60, %v6887_v40  ;;  %v2416_v4 = vcombine.high %v6924_v57, %v6927_v58  ;;  %v6951_v5 = vrot.slane %v2315_v63, %v6791_v8 }
  0x1e   : > { %413 = vrot.lane.b32.xlu1 %v177_v19, %s6736_s18  ;;  %409 = vrot.lane.b32.xlu0 %v175_v20, %s6736_s18  ;;  %v228_v32 = vcombine.high %v6917_v54, %v6914_v53 }
  0x1f   : > { %v313_v9 = vcombine.high %v303_v1, %v6735_v3 }
  0x20   : > { %v242_v14 = vrot.slane %v228_v32, %v6887_v40 }
  0x22   : > { %1605 = vrot.lane.b32.xlu1 %v174_v11, %s6737_s19  ;;  %1601 = vrot.lane.b32.xlu0 %v172_v7, %s6737_s19  ;;  %v2400_v11 = vcombine.high %v6833_v21, %v6843_v23  ;;  %v246_v36 = vcombine.high %v242_v14, %v6735_v3 }
  0x26   : > { %1613 = vrot.lane.b32.xlu1 %v178_v10, %s6737_s19  ;;  %1609 = vrot.lane.b32.xlu0 %v176_v6, %s6737_s19  ;;  %v6954_v6 = vrot.slane %v2331_v0, %v6791_v8  ;;  %v2384_v10 = vcombine.high %v6836_v22, %v6846_v24 }
  0x28   : > { %v2347_v7 = vcombine.low %v6951_v5, %v6954_v6 }
  0x2a   : > { %1603 = vrot.lane.b32.xlu1 %v6805_v15, %s6737_s19  ;;  %1599 = vrot.lane.b32.xlu0 %v6808_v16, %s6737_s19  ;;  %v6969_v15 = vrot.slane %v2384_v10, %v6791_v8  ;;  %v6972_v16 = vrot.slane %v2400_v11, %v6791_v8 }
  0x2c   : > { %v2431_v17 = vcombine.low %v6969_v15, %v6972_v16 }
  0x2e   : > { %1611 = vrot.lane.b32.xlu1 %v177_v19, %s6737_s19  ;;  %1607 = vrot.lane.b32.xlu0 %v175_v20, %s6737_s19  ;;  %v2348_v19 = vcombine.high %v6951_v5, %v6954_v6  ;;  %v6982_v20 = vld [vmem:[%s6785_s17 + $0x22] sm:$0xff] }
  0x32   : > { %3021 = vrot.lane.b32.xlu1 %v6833_v21, %s6736_s18  ;;  %3017 = vrot.lane.b32.xlu0 %v6836_v22, %s6736_s18 }
  0x36   : > { %3029 = vrot.lane.b32.xlu1 %v6843_v23, %s6736_s18  ;;  %3025 = vrot.lane.b32.xlu0 %v6846_v24, %s6736_s18 }
  0x3a   : > { %3019 = vrot.lane.b32.xlu1 %v6853_v25, %s6736_s18  ;;  %3015 = vrot.lane.b32.xlu0 %v6856_v26, %s6736_s18 }
  0x3e   : > { %3027 = vrot.lane.b32.xlu1 %v6863_v27, %s6736_s18  ;;  %3023 = vrot.lane.b32.xlu0 %v6866_v28, %s6736_s18 }
  0x42   : > { %3745 = vrot.lane.b32.xlu1 %v6833_v21, %s6737_s19  ;;  %3741 = vrot.lane.b32.xlu0 %v6836_v22, %s6737_s19  ;;  %v6985_v21 = vld [vmem:[%s6785_s17 + $0x3a] sm:$0xff]  ;;  %v245_v22 = vcombine.high %v235_v2, %v6735_v3 }
  0x46   : > { %3753 = vrot.lane.b32.xlu1 %v6843_v23, %s6737_s19  ;;  %3749 = vrot.lane.b32.xlu0 %v6846_v24, %s6737_s19  ;;  %v2316_v23 = vcombine.high %v6856_v26, %v6866_v28  ;;  %v2332_v24 = vcombine.high %v6853_v25, %v6863_v27 }
  0x48   : > { %v7000_v30 = vrot.slane %v2316_v23, %v6791_v8  ;;  %v7003_v31 = vrot.slane %v2332_v24, %v6791_v8 }
  0x4a   : > { %3743 = vrot.lane.b32.xlu1 %v6853_v25, %s6737_s19  ;;  %3739 = vrot.lane.b32.xlu0 %v6856_v26, %s6737_s19  ;;  %v310_v26 = vrot.slane %v296_v18, %v6887_v40  ;;  %v2432_v25 = vcombine.high %v6969_v15, %v6972_v16  ;;  %v2364_v18 = vcombine.high %v7000_v30, %v7003_v31 }
  0x4c   : > { %v314_v35 = vcombine.high %v310_v26, %v6735_v3 }
  0x4e   : > { %3751 = vrot.lane.b32.xlu1 %v6863_v27, %s6737_s19  ;;  %3747 = vrot.lane.b32.xlu0 %v6866_v28, %s6737_s19  ;;  %v2363_v27 = vcombine.low %v7000_v30, %v7003_v31  ;;  %v7017_v28 = vld [vmem:[%s6785_s17 + $0x2] sm:$0xff] }
  0x52   : > { %344 = vrot.lane.b32.xlu0 %v311_v48, %s6739_s20  ;;  %316 = vrot.lane.b32.xlu1 %v243_v49, %s6739_s20 }
  0x56   : > { %348 = vrot.lane.b32.xlu0 %v294_v55, %s6740_s21  ;;  %320 = vrot.lane.b32.xlu1 %v226_v56, %s6740_s21 }
  0x5a   : > { %352 = vrot.lane.b32.xlu0 %v312_v61, %s6741_s22  ;;  %324 = vrot.lane.b32.xlu1 %v244_v62, %s6741_s22 }
  0x5e   : > { %356 = vrot.lane.b32.xlu0 %v303_v1, %s6742_s23  ;;  %328 = vrot.lane.b32.xlu1 %v235_v2, %s6742_s23 }
  0x62   : > { %360 = vrot.lane.b32.xlu0 %v313_v9, %s6743_s24  ;;  %5157 = vrot.lane.b32.xlu1 %v6966_v12, %s6736_s18 }
  0x66   : > { %5161 = vrot.lane.b32.xlu0 %v6982_v20, %s6736_s18  ;;  %5165 = vrot.lane.b32.xlu1 %v6985_v21, %s6736_s18 }
  0x6a   : > { %5169 = vrot.lane.b32.xlu0 %v6997_v29, %s6736_s18  ;;  %332 = vrot.lane.b32.xlu1 %v245_v22, %s6743_s24 }
  0x6e   : > { %364 = vrot.lane.b32.xlu0 %v310_v26, %s6744_s25  ;;  %5155 = vrot.lane.b32.xlu1 %v7017_v28, %s6736_s18 }
  0x72   : > { %5159 = vrot.lane.b32.xlu0 %v7025_v33, %s6736_s18  ;;  %5163 = vrot.lane.b32.xlu1 %v7028_v13, %s6736_s18 }
  0x76   : > { %5167 = vrot.lane.b32.xlu0 %v7038_v34, %s6736_s18  ;;  %336 = vrot.lane.b32.xlu1 %v242_v14, %s6744_s25 }
  0x7a   : > { %368 = vrot.lane.b32.xlu0 %v314_v35, %s6745_s26  ;;  %340 = vrot.lane.b32.xlu1 %v246_v36, %s6745_s26 }
  0x84   : > { %v412_v37 = vpop.permute.xlu1 %411  ;;  %v404_v38 = vpop.permute.xlu0 %403 }
  0x85   : > { %v493_v39 = vcombine.low %v404_v38, %v412_v37  ;;  %v494_v45 = vcombine.high %v404_v38, %v412_v37 }
  0x87   : > { %v501_v48 = vrot.slane %v493_v39, %v6791_v8  ;;  %v508_v53 = vrot.slane %v494_v45, %v6791_v8 }
  0x88   : > { %v416_v41 = vpop.permute.xlu1 %415  ;;  %v408_v42 = vpop.permute.xlu0 %407 }
  0x89   : > { %v509_v46 = vcombine.low %v408_v42, %v416_v41  ;;  %v510_v47 = vcombine.high %v408_v42, %v416_v41 }
  0x8b   : > { %v517_v49 = vrot.slane %v509_v46, %v6791_v8  ;;  %v524_v50 = vrot.slane %v510_v47, %v6791_v8 }
  0x8c   : > { %v406_v51 = vpop.permute.xlu1 %405  ;;  %v402_v52 = vpop.permute.xlu0 %401 }
  0x8d   : > { %v526_v54 = vcombine.high %v501_v48, %v517_v49  ;;  %v541_v56 = vcombine.low %v508_v53, %v524_v50  ;;  %v525_v2 = vcombine.low %v501_v48, %v517_v49  ;;  %v542_v22 = vcombine.high %v508_v53, %v524_v50 }
  0x8f   : > { %v540_v55 = vrot.slane %v526_v54, %v6887_v40  ;;  %v549_v11 = vrot.slane %v541_v56, %v6887_v40  ;;  %v556_v35 = vrot.slane %v542_v22, %v6887_v40  ;;  %v7062_v37 = vrot.slane %v525_v2, %v6887_v40 }
  0x90   : > { %v414_v60 = vpop.permute.xlu1 %413  ;;  %v410_v61 = vpop.permute.xlu0 %409 }
  0x91   : > { %v441_v62 = vcombine.low %v406_v51, %v414_v60  ;;  %v442_v63 = vcombine.high %v406_v51, %v414_v60  ;;  %v425_v0 = vcombine.low %v402_v52, %v410_v61  ;;  %v426_v1 = vcombine.high %v402_v52, %v410_v61  ;;  %594 = vrot.lane.b32.xlu0 %v540_v55, %s6740_s21 }
  0x92   : > { %v557_v46 = vcombine.high %v7062_v37, %v6735_v3  ;;  %v558_v54 = vcombine.high %v540_v55, %v6735_v3  ;;  %v560_v22 = vcombine.high %v556_v35, %v6735_v3 }
  0x93   : > { %v449_v9 = vrot.slane %v441_v62, %v6791_v8  ;;  %v433_v10 = vrot.slane %v425_v0, %v6791_v8  ;;  %v456_v23 = vrot.slane %v442_v63, %v6791_v8  ;;  %v440_v24 = vrot.slane %v426_v1, %v6791_v8 }
  0x94   : > { %v1606_v26 = vpop.permute.xlu1 %1605  ;;  %v1602_v32 = vpop.permute.xlu0 %1601  ;;  %v559_v0 = vcombine.high %v549_v11, %v6735_v3 }
  0x95   : > { %602 = vrot.lane.b32.xlu0 %v549_v11, %s6742_s23  ;;  %v458_v14 = vcombine.high %v433_v10, %v449_v9  ;;  %v473_v41 = vcombine.low %v440_v24, %v456_v23  ;;  %v457_v47 = vcombine.low %v433_v10, %v449_v9  ;;  %v474_v51 = vcombine.high %v440_v24, %v456_v23 }
  0x97   : > { %v472_v36 = vrot.slane %v458_v14, %v6887_v40  ;;  %v481_v50 = vrot.slane %v473_v41, %v6887_v40  ;;  %v488_v61 = vrot.slane %v474_v51, %v6887_v40  ;;  %v7080_v62 = vrot.slane %v457_v47, %v6887_v40 }
  0x98   : > { %v1614_v38 = vpop.permute.xlu1 %1613  ;;  %v1610_v39 = vpop.permute.xlu0 %1609 }
  0x99   : > { %610 = vrot.lane.b32.xlu0 %v556_v35, %s6744_s25  ;;  %566 = vrot.lane.b32.xlu1 %v472_v36, %s6740_s21  ;;  %v1707_v42 = vcombine.low %v1606_v26, %v1614_v38  ;;  %v1691_v45 = vcombine.low %v1602_v32, %v1610_v39  ;;  %v489_v10 = vcombine.high %v7080_v62, %v6735_v3 }
  0x9b   : > { %v1715_v52 = vrot.slane %v1707_v42, %v6791_v8  ;;  %v1699_v53 = vrot.slane %v1691_v45, %v6791_v8  ;;  %v490_v42 = vcombine.high %v472_v36, %v6735_v3  ;;  %v1708_v45 = vcombine.high %v1606_v26, %v1614_v38 }
  0x9c   : > { %v7068_v48 = vpop.permute.xlu1 %1603  ;;  %v7070_v49 = vpop.permute.xlu0 %1599 }
  0x9d   : > { %590 = vrot.lane.b32.xlu0 %v557_v46, %s6739_s20  ;;  %574 = vrot.lane.b32.xlu1 %v481_v50, %s6742_s23  ;;  %v1723_v63 = vcombine.low %v1699_v53, %v1715_v52  ;;  %v1692_v46 = vcombine.high %v1602_v32, %v1610_v39  ;;  %v1724_v47 = vcombine.high %v1699_v53, %v1715_v52 }
  0x9e   : > { %v1722_v36 = vrot.slane %v1708_v45, %v6791_v8  ;;  %v492_v52 = vcombine.high %v488_v61, %v6735_v3 }
  0x9f   : > { %v7097_v23 = vrot.slane %v1723_v63, %v6887_v40  ;;  %v1706_v26 = vrot.slane %v1692_v46, %v6791_v8  ;;  %v1738_v32 = vrot.slane %v1724_v47, %v6887_v40 }
  0xa0   : > { %v1612_v56 = vpop.permute.xlu1 %1611  ;;  %v1608_v60 = vpop.permute.xlu0 %1607 }
  0xa1   : > { %598 = vrot.lane.b32.xlu0 %v558_v54, %s6741_s22  ;;  %582 = vrot.lane.b32.xlu1 %v488_v61, %s6744_s25  ;;  %v1639_v1 = vcombine.low %v7068_v48, %v1612_v56  ;;  %v1623_v2 = vcombine.low %v7070_v49, %v1608_v60  ;;  %v1755_v35 = vcombine.high %v7097_v23, %v6735_v3 }
  0xa3   : > { %v1647_v11 = vrot.slane %v1639_v1, %v6791_v8  ;;  %v1631_v24 = vrot.slane %v1623_v2, %v6791_v8  ;;  %v1739_v1 = vcombine.low %v1706_v26, %v1722_v36  ;;  %v1640_v2 = vcombine.high %v7068_v48, %v1612_v56 }
  0xa4   : > { %v7087_v9 = vpop.permute.xlu1 %3021  ;;  %v7089_v55 = vpop.permute.xlu0 %3017 }
  0xa5   : > { %606 = vrot.lane.b32.xlu0 %v559_v0, %s6743_s24  ;;  %562 = vrot.lane.b32.xlu1 %v489_v10, %s6739_s20  ;;  %v1655_v51 = vcombine.low %v1631_v24, %v1647_v11  ;;  %v491_v0 = vcombine.high %v481_v50, %v6735_v3  ;;  %v1756_v50 = vcombine.high %v1738_v32, %v6735_v3 }
  0xa6   : > { %v1624_v10 = vcombine.high %v7070_v49, %v1608_v60  ;;  %v1656_v45 = vcombine.high %v1631_v24, %v1647_v11  ;;  %v1747_v46 = vrot.slane %v1739_v1, %v6887_v40 }
  0xa7   : > { %v7126_v53 = vrot.slane %v1655_v51, %v6887_v40 }
  0xa8   : > { %v7101_v14 = vpop.permute.xlu1 %3029  ;;  %v7103_v41 = vpop.permute.xlu0 %3025  ;;  %v1638_v48 = vrot.slane %v1624_v10, %v6791_v8  ;;  %v1670_v49 = vrot.slane %v1656_v45, %v6887_v40  ;;  %v1757_v11 = vcombine.high %v1747_v46, %v6735_v3 }
  0xa9   : > { %614 = vrot.lane.b32.xlu0 %v560_v22, %s6745_s26  ;;  %570 = vrot.lane.b32.xlu1 %v490_v42, %s6741_s22  ;;  %v1687_v61 = vcombine.high %v7126_v53, %v6735_v3 }
  0xaa   : > { %v1688_v47 = vcombine.high %v1670_v49, %v6735_v3 }
  0xac   : > { %v7110_v54 = vpop.permute.xlu1 %3019  ;;  %v7112_v63 = vpop.permute.xlu0 %3015 }
  0xad   : > { %1788 = vrot.lane.b32.xlu0 %v1755_v35, %s6739_s20  ;;  %578 = vrot.lane.b32.xlu1 %v491_v0, %s6743_s24  ;;  %v1654_v35 = vrot.slane %v1640_v2, %v6791_v8 }
  0xaf   : > { %v1671_v51 = vcombine.low %v1638_v48, %v1654_v35 }
  0xb0   : > { %v7120_v38 = vpop.permute.xlu1 %3027  ;;  %v7122_v39 = vpop.permute.xlu0 %3023 }
  0xb1   : > { %1792 = vrot.lane.b32.xlu0 %v1738_v32, %s6740_s21  ;;  %586 = vrot.lane.b32.xlu1 %v492_v52, %s6745_s26  ;;  %v1679_v52 = vrot.slane %v1671_v51, %v6887_v40 }
  0xb4   : > { %v7133_v22 = vpop.permute.xlu1 %3745  ;;  %v7135_v42 = vpop.permute.xlu0 %3741 }
  0xb5   : > { %1796 = vrot.lane.b32.xlu0 %v1756_v50, %s6741_s22  ;;  %1760 = vrot.lane.b32.xlu1 %v1687_v61, %s6739_s20  ;;  %v1740_v50 = vcombine.high %v1706_v26, %v1722_v36  ;;  %v1689_v26 = vcombine.high %v1679_v52, %v6735_v3 }
  0xb7   : > { %v1754_v10 = vrot.slane %v1740_v50, %v6887_v40 }
  0xb8   : > { %v7144_v56 = vpop.permute.xlu0 %3749  ;;  %v7148_v60 = vpop.permute.xlu1 %3753 }
  0xb9   : > { %1800 = vrot.lane.b32.xlu0 %v1747_v46, %s6742_s23  ;;  %1764 = vrot.lane.b32.xlu1 %v1670_v49, %s6740_s21  ;;  %v7193_v46 = vrot.slane %v2415_v59, %v6887_v40 }
  0xbc   : > { %v7152_v24 = vpop.permute.xlu0 %3739  ;;  %v7157_v0 = vpop.permute.xlu1 %3743 }
  0xbd   : > { %1804 = vrot.lane.b32.xlu0 %v1757_v11, %s6743_s24  ;;  %1768 = vrot.lane.b32.xlu1 %v1688_v47, %s6741_s22  ;;  %v1672_v11 = vcombine.high %v1638_v48, %v1654_v35  ;;  %v7220_v35 = vrot.slane %v2347_v7, %v6887_v40  ;;  %v2362_v7 = vrot.slane %v2348_v19, %v6887_v40 }
  0xbe   : > { %v2446_v19 = vrot.slane %v2432_v25, %v6887_v40 }
  0xbf   : > { %v1686_v51 = vrot.slane %v1672_v11, %v6887_v40  ;;  %8348 = vst [vmem:[#allocation2_spill] sm:$0xff] %v7220_v35  ;;  %v2379_v57 = vcombine.high %v7220_v35, %v6735_v3  ;;  %v3848_v35 = vcombine.high %v7133_v22, %v7148_v60 }
  0xc0   : > { %v7159_v32 = vpop.permute.xlu0 %3747  ;;  %v7169_v2 = vpop.permute.xlu1 %3751  ;;  %v2450_v15 = vcombine.high %v2446_v19, %v6735_v3 }
  0xc1   : > { %5885 = vrot.lane.b32.xlu0 %v6982_v20, %s6737_s19  ;;  %1772 = vrot.lane.b32.xlu1 %v1679_v52, %s6742_s23  ;;  %v1690_v48 = vcombine.high %v1686_v51, %v6735_v3 }
  0xc4   : > { %v7165_v1 = vpop.permute.xlu0 %344  ;;  %v7179_v36 = vpop.permute.xlu1 %316 }
  0xc5   : > { %5893 = vrot.lane.b32.xlu0 %v6997_v29, %s6737_s19  ;;  %5881 = vrot.lane.b32.xlu1 %v6966_v12, %s6737_s19 }
  0xc8   : > { %v7174_v61 = vpop.permute.xlu0 %348  ;;  %v7195_v49 = vpop.permute.xlu1 %320 }
  0xc9   : > { %1808 = vrot.lane.b32.xlu0 %v1754_v10, %s6744_s25  ;;  %5889 = vrot.lane.b32.xlu1 %v6985_v21, %s6737_s19 }
  0xcc   : > { %v7185_v45 = vpop.permute.xlu0 %352  ;;  %v7207_v59 = vpop.permute.xlu1 %324 }
  0xcd   : > { %5883 = vrot.lane.b32.xlu0 %v7025_v33, %s6737_s19  ;;  %1776 = vrot.lane.b32.xlu1 %v1689_v26, %s6743_s24  ;;  %v1758_v33 = vcombine.high %v1754_v10, %v6735_v3  ;;  %v3123_v10 = vcombine.low %v7087_v9, %v7101_v14  ;;  %v3107_v26 = vcombine.low %v7089_v55, %v7103_v41 }
  0xcf   : > { %v3115_v5 = vrot.slane %v3107_v26, %v6791_v8  ;;  %v2378_v26 = vrot.slane %v2364_v18, %v6887_v40 }
  0xd0   : > { %v7200_v47 = vpop.permute.xlu0 %356  ;;  %v7227_v50 = vpop.permute.xlu1 %328 }
  0xd1   : > { %5891 = vrot.lane.b32.xlu0 %v7038_v34, %s6737_s19  ;;  %5879 = vrot.lane.b32.xlu1 %v7017_v28, %s6737_s19  ;;  %v2447_v34 = vcombine.high %v7193_v46, %v6735_v3  ;;  %v2430_v28 = vrot.slane %v2416_v4, %v6887_v40  ;;  %v2439_v4 = vrot.slane %v2431_v17, %v6887_v40 }
  0xd2   : > { %v2380_v17 = vcombine.high %v2362_v7, %v6735_v3  ;;  %v2382_v30 = vcombine.high %v2378_v26, %v6735_v3 }
  0xd3   : > { %v2448_v52 = vcombine.high %v2430_v28, %v6735_v3  ;;  %v2449_v11 = vcombine.high %v2439_v4, %v6735_v3 }
  0xd5   : > { %1812 = vrot.lane.b32.xlu0 %v1758_v33, %s6745_s26  ;;  %5887 = vrot.lane.b32.xlu1 %v7028_v13, %s6737_s19  ;;  %v7222_v13 = vpop.permute.xlu0 %360  ;;  %v7248_v33 = vpop.permute.xlu1 %5157 }
  0xd9   : > { %2480 = vrot.lane.b32.xlu0 %v2447_v34, %s6739_s20  ;;  %1780 = vrot.lane.b32.xlu1 %v1686_v51, %s6744_s25  ;;  %v7232_v58 = vpop.permute.xlu0 %5161  ;;  %v3131_v34 = vrot.slane %v3123_v10, %v6791_v8  ;;  %v7263_v51 = vpop.permute.xlu1 %5165 }
  0xdd   : > { %2484 = vrot.lane.b32.xlu0 %v2430_v28, %s6740_s21  ;;  %1784 = vrot.lane.b32.xlu1 %v1690_v48, %s6745_s26  ;;  %v7256_v6 = vpop.permute.xlu0 %5169  ;;  %v2371_v28 = vrot.slane %v2363_v27, %v6887_v40  ;;  %v3139_v48 = vcombine.low %v3115_v5, %v3131_v34  ;;  %v7285_v10 = vpop.permute.xlu1 %332 }
  0xdf   : > { %v2381_v16 = vcombine.high %v2371_v28, %v6735_v3  ;;  %v7281_v25 = vrot.slane %v3139_v48, %v6887_v40 }
  0xe1   : > { %2488 = vrot.lane.b32.xlu0 %v2448_v52, %s6741_s22  ;;  %2452 = vrot.lane.b32.xlu1 %v2379_v57, %s6739_s20  ;;  %v3055_v52 = vcombine.low %v7110_v54, %v7120_v38  ;;  %v3039_v57 = vcombine.low %v7112_v63, %v7122_v39  ;;  %8349 = vst [vmem:[#allocation3_spill] sm:$0xff] %v7281_v25 }
  0xe2   : > { %v3171_v48 = vcombine.high %v7281_v25, %v6735_v3 }
  0xe3   : > { %v3063_v27 = vrot.slane %v3055_v52, %v6791_v8 }
  0xe5   : > { %2492 = vrot.lane.b32.xlu0 %v2439_v4, %s6742_s23  ;;  %2456 = vrot.lane.b32.xlu1 %v2362_v7, %s6740_s21  ;;  %v7274_v4 = vpop.permute.xlu0 %364  ;;  %v3047_v7 = vrot.slane %v3039_v57, %v6791_v8  ;;  %v7302_v57 = vpop.permute.xlu1 %5155 }
  0xe7   : > { %v3071_v52 = vcombine.low %v3047_v7, %v3063_v27 }
  0xe9   : > { %2496 = vrot.lane.b32.xlu0 %v2449_v11, %s6743_s24  ;;  %2460 = vrot.lane.b32.xlu1 %v2380_v17, %s6741_s22  ;;  %v3124_v11 = vcombine.high %v7087_v9, %v7101_v14  ;;  %v3108_v17 = vcombine.high %v7089_v55, %v7103_v41  ;;  %v7310_v55 = vrot.slane %v3071_v52, %v6887_v40 }
  0xeb   : > { %v3138_v31 = vrot.slane %v3124_v11, %v6791_v8  ;;  %v3122_v18 = vrot.slane %v3108_v17, %v6791_v8  ;;  %8350 = vst [vmem:[#allocation4_spill] sm:$0xff] %v7310_v55  ;;  %v3103_v11 = vcombine.high %v7310_v55, %v6735_v3  ;;  %v3847_v17 = vcombine.low %v7133_v22, %v7148_v60 }
  0xed   : > { %2500 = vrot.lane.b32.xlu0 %v2446_v19, %s6744_s25  ;;  %2464 = vrot.lane.b32.xlu1 %v2371_v28, %s6742_s23  ;;  %v3140_v19 = vcombine.high %v3115_v5, %v3131_v34  ;;  %v7297_v28 = vpop.permute.xlu0 %5159  ;;  %v3155_v41 = vcombine.low %v3122_v18, %v3138_v31  ;;  %v3056_v5 = vcombine.high %v7110_v54, %v7120_v38 }
  0xee   : > { %v3855_v52 = vrot.slane %v3847_v17, %v6791_v8 }
  0xef   : > { %v3154_v9 = vrot.slane %v3140_v19, %v6887_v40  ;;  %v3831_v19 = vcombine.low %v7135_v42, %v7144_v56  ;;  %v3070_v38 = vrot.slane %v3056_v5, %v6791_v8 }
  0xf1   : > { %2504 = vrot.lane.b32.xlu0 %v2450_v15, %s6745_s26  ;;  %2468 = vrot.lane.b32.xlu1 %v2381_v16, %s6743_s24  ;;  %v7312_v14 = vpop.permute.xlu0 %5167  ;;  %v3172_v34 = vcombine.high %v3154_v9, %v6735_v3  ;;  %v3040_v15 = vcombine.high %v7112_v63, %v7122_v39  ;;  %v3072_v16 = vcombine.high %v3047_v7, %v3063_v27 }
  0xf2   : > { %v3163_v63 = vrot.slane %v3155_v41, %v6887_v40 }
  0xf3   : > { %v3054_v39 = vrot.slane %v3040_v15, %v6791_v8  ;;  %v3086_v27 = vrot.slane %v3072_v16, %v6887_v40 }
  0xf4   : > { %v3173_v41 = vcombine.high %v3163_v63, %v6735_v3 }
  0xf5   : > { %3204 = vrot.lane.b32.xlu0 %v3171_v48, %s6739_s20  ;;  %2472 = vrot.lane.b32.xlu1 %v2378_v26, %s6744_s25  ;;  %v7321_v26 = vpop.permute.xlu1 %5163  ;;  %v7331_v54 = vpop.permute.xlu0 %368  ;;  %v3156_v48 = vcombine.high %v3122_v18, %v3138_v31  ;;  %v3104_v5 = vcombine.high %v3086_v27, %v6735_v3  ;;  %v3779_v31 = vcombine.low %v7157_v0, %v7169_v2 }
  0xf6   : > { %v3763_v18 = vcombine.low %v7152_v24, %v7159_v32 }
  0xf8   : > { %v7367_v55 = vrot.slane %v3763_v18, %v6791_v8 }
  0xf9   : > { %3208 = vrot.lane.b32.xlu0 %v3154_v9, %s6740_s21  ;;  %2476 = vrot.lane.b32.xlu1 %v2382_v30, %s6745_s26  ;;  %v7338_v7 = vpop.permute.xlu1 %336  ;;  %v3839_v30 = vrot.slane %v3831_v19, %v6791_v8 }
  0xfb   : > { %v3863_v15 = vcombine.low %v3839_v30, %v3855_v52 }
  0xfd   : > { %3212 = vrot.lane.b32.xlu0 %v3172_v34, %s6741_s22  ;;  %3176 = vrot.lane.b32.xlu1 %v3103_v11, %s6739_s20  ;;  %v3087_v34 = vcombine.low %v3054_v39, %v3070_v38  ;;  %v3170_v11 = vrot.slane %v3156_v48, %v6887_v40  ;;  %v7352_v17 = vpop.permute.xlu1 %340  ;;  %v7361_v48 = vrot.slane %v3863_v15, %v6887_v40 }
  0xfe   : > { %v3832_v15 = vcombine.high %v7135_v42, %v7144_v56  ;;  %v6666_v42 = vld [vmem:[%s8342_s1 + $0x8] sm:$0xff]  ;;  %v7392_v56 = vrot.slane %v3848_v35, %v6791_v8 }
  0xff   : > { %v3095_v19 = vrot.slane %v3087_v34, %v6887_v40 }
 0x100   : > { %v7395_v60 = vrot.slane %v3832_v15, %v6791_v8 }
 0x101   : > { %3216 = vrot.lane.b32.xlu0 %v3163_v63, %s6742_s23  ;;  %3180 = vrot.lane.b32.xlu1 %v3086_v27, %s6740_s21  ;;  %v3174_v27 = vcombine.high %v3170_v11, %v6735_v3  ;;  %v3105_v34 = vcombine.high %v3095_v19, %v6735_v3 }
 0x103   : > { %v595_v9 = vpop.permute.xlu0 %594 }
 0x105   : > { %3220 = vrot.lane.b32.xlu0 %v3173_v41, %s6743_s24  ;;  %3184 = vrot.lane.b32.xlu1 %v3104_v5, %s6741_s22  ;;  %v3088_v41 = vcombine.high %v3054_v39, %v3070_v38  ;;  %v7364_v5 = vrot.slane %v3779_v31, %v6791_v8  ;;  %v3864_v38 = vcombine.high %v3839_v30, %v3855_v52 }
 0x107   : > { %v603_v16 = vpop.permute.xlu0 %602  ;;  %v3795_v31 = vcombine.low %v7367_v55, %v7364_v5  ;;  %v3102_v22 = vrot.slane %v3088_v41, %v6887_v40  ;;  %v635_v41 = vsel %vm633_vm1, %v6666_v42, 0 }
 0x109   : > { %3224 = vrot.lane.b32.xlu0 %v3170_v11, %s6744_s25  ;;  %3188 = vrot.lane.b32.xlu1 %v3095_v19, %s6742_s23  ;;  %v3895_v11 = vcombine.high %v7361_v48, %v6735_v3  ;;  %v3106_v15 = vcombine.high %v3102_v22, %v6735_v3 }
 0x10b   : > { %v7357_v63 = vpop.permute.xlu0 %610  ;;  %v7369_v25 = vpop.permute.xlu1 %566 }
 0x10d   : > { %3228 = vrot.lane.b32.xlu0 %v3174_v27, %s6745_s26  ;;  %3192 = vrot.lane.b32.xlu1 %v3105_v34, %s6743_s24  ;;  %v3878_v27 = vrot.slane %v3864_v38, %v6887_v40  ;;  %v7419_v38 = vand.u32 4294901760, %v635_v41 }
 0x10f   : > { %v591_v39 = vpop.permute.xlu0 %590  ;;  %v7384_v19 = vpop.permute.xlu1 %574 }
 0x110   : > { %v624_v18 = vsel %vm371_vm0, %v7062_v37, %v591_v39  ;;  %v385_v37 = vsel %vm371_vm0, %v6894_v43, %v7165_v1  ;;  %v7409_v39 = vrot.slane %v3795_v31, %v6887_v40  ;;  %v3879_v1 = vcombine.low %v7395_v60, %v7392_v56 }
 0x111   : > { %3928 = vrot.lane.b32.xlu0 %v3895_v11, %s6739_s20  ;;  %3196 = vrot.lane.b32.xlu1 %v3102_v22, %s6744_s25  ;;  %v625_v52 = vsel %vm373_vm2, %v624_v18, %v595_v9  ;;  %v386_v43 = vsel %vm373_vm2, %v385_v37, %v7174_v61  ;;  %v3780_v9 = vcombine.high %v7157_v0, %v7169_v2 }
 0x112   : > { %v3764_v11 = vcombine.high %v7152_v24, %v7159_v32  ;;  %v3796_v61 = vcombine.high %v7367_v55, %v7364_v5  ;;  %v3896_v22 = vcombine.high %v3878_v27, %v6735_v3  ;;  %v372_v0 = vsel %vm371_vm0, %v6897_v44, %v7179_v36 }
 0x113   : > { %v599_v30 = vpop.permute.xlu0 %598  ;;  %v7405_v34 = vpop.permute.xlu1 %582  ;;  %v387_v2 = vsel %vm375_vm3, %v386_v43, %v7185_v45  ;;  %v3827_v24 = vcombine.high %v7409_v39, %v6735_v3  ;;  %v4523_v55 = vcombine.low %v6966_v12, %v6985_v21  ;;  %v4539_v44 = vcombine.low %v6982_v20, %v6997_v29 }
 0x114   : > { %v626_v35 = vsel %vm375_vm3, %v625_v52, %v599_v30  ;;  %v3887_v36 = vrot.slane %v3879_v1, %v6887_v40  ;;  %v7445_v45 = vsub.f32 %v635_v41, %v7419_v38  ;;  %v388_v5 = vsel %vm377_vm4, %v387_v2, %v7200_v47 }
 0x115   : > { %3932 = vrot.lane.b32.xlu0 %v3878_v27, %s6740_s21  ;;  %3200 = vrot.lane.b32.xlu1 %v3106_v15, %s6745_s26  ;;  %v627_v31 = vsel %vm377_vm4, %v626_v35, %v603_v16  ;;  %v7448_v16 = vrot.slane %v3780_v9, %v6791_v8  ;;  %v7457_v27 = vrot.slane %v3764_v11, %v6791_v8 }
 0x116   : > { %v3810_v43 = vrot.slane %v3796_v61, %v6887_v40  ;;  %v7470_v1 = vrot.slane %v4523_v55, %v6791_v8  ;;  %v7473_v9 = vrot.slane %v4539_v44, %v6791_v8  ;;  %v389_v11 = vsel %vm379_vm5, %v388_v5, %v7222_v13  ;;  %v6720_v5 = vld [vmem:[%s6785_s17 + $0x1a] ss:$48 sps:$4 sm:$0xff]  }
 0x117   : > { %v607_v18 = vpop.permute.xlu0 %606  ;;  %v563_v37 = vpop.permute.xlu1 %562 }
 0x118   : > { %v628_v42 = vsel %vm379_vm5, %v627_v31, %v607_v18  ;;  %v617_v32 = vsel %vm371_vm0, %v7080_v62, %v563_v37  ;;  %v374_v62 = vsel %vm373_vm2, %v372_v0, %v7195_v49  ;;  %v392_v49 = vld [vmem:[%s8342_s1] sm:$0xff]  ;;  %v713_v31 = vand.u32 4294901760, %v7445_v45 }
 0x119   : > { %3936 = vrot.lane.b32.xlu0 %v3896_v22, %s6741_s22  ;;  %3900 = vrot.lane.b32.xlu1 %v3827_v24, %s6739_s20  ;;  %v629_v52 = vsel %vm381_vm6, %v628_v42, %v7357_v63  ;;  %v618_v41 = vsel %vm373_vm2, %v617_v32, %v7369_v25  ;;  %v376_v25 = vsel %vm375_vm3, %v374_v62, %v7207_v59  ;;  %v1110_v2 = vsel %vm633_vm1, %v392_v49, 0  ;;  %v6718_v62 = vld [vmem:[%s6785_s17 + $0x2] ss:$48 sps:$4 sm:$0xff]  }
 0x11a   : > { %v3880_v18 = vcombine.high %v7395_v60, %v7392_v56  ;;  %v3897_v0 = vcombine.high %v3887_v36, %v6735_v3  ;;  %v3811_v59 = vcombine.low %v7457_v27, %v7448_v16  ;;  %v3828_v56 = vcombine.high %v3810_v43, %v6735_v3 }
 0x11b   : > { %v615_v30 = vpop.permute.xlu0 %614  ;;  %v571_v15 = vpop.permute.xlu1 %570  ;;  %v378_v60 = vsel %vm377_vm4, %v376_v25, %v7227_v50  ;;  %v390_v24 = vsel %vm381_vm6, %v389_v11, %v7274_v4  ;;  %v4555_v55 = vcombine.low %v7470_v1, %v7473_v9  ;;  %v714_v50 = vsub.f32 %v7445_v45, %v713_v31 }
 0x11c   : > { %v630_v35 = vsel %vm383_vm7, %v629_v52, %v615_v30  ;;  %v619_v63 = vsel %vm375_vm3, %v618_v41, %v571_v15  ;;  %v3894_v4 = vrot.slane %v3880_v18, %v6887_v40  ;;  %v7518_v52 = vand.u32 4294901760, %v1110_v2 }
 0x11d   : > { %v642_v47 = vsel %vm637_vm8, %v630_v35, 0  ;;  %3940 = vrot.lane.b32.xlu0 %v3887_v36, %s6742_s23  ;;  %3904 = vrot.lane.b32.xlu1 %v3810_v43, %s6740_s21  ;;  %v620_v42 = vsel %vm377_vm4, %v619_v63, %v7384_v19  ;;  %v391_v19 = vsel %vm383_vm7, %v390_v24, %v7331_v54  ;;  %v380_v30 = vsel %vm379_vm5, %v378_v60, %v7285_v10 }
 0x11e   : > { %v7479_v61 = vand.u32 4294901760, %v642_v47  ;;  %v3819_v41 = vrot.slane %v3811_v59, %v6887_v40  ;;  %v382_v43 = vsel %vm381_vm6, %v380_v30, %v7338_v7  ;;  %v1116_v49 = vsel %vm637_vm8, %v391_v19, 0 }
 0x11f   : > { %v7485_v22 = vpop.permute.xlu0 %1788  ;;  %v579_v37 = vpop.permute.xlu1 %578  ;;  %v7532_v63 = vrot.slane %v4555_v55, %v6887_v40  ;;  %v384_v10 = vsel %vm383_vm7, %v382_v43, %v7352_v17  ;;  %v715_v11 = vand.u32 4294901760, %v714_v50  ;;  %v7544_v59 = vrot.slane %v6718_v62, %v6791_v8 }
 0x120   : > { %v7492_v13 = vsub.f32 %v642_v47, %v7479_v61  ;;  %675 = vmatprep.subr.mxu0 %v7479_v61  ;;  %v621_v32 = vsel %vm379_vm5, %v620_v42, %v579_v37  ;;  %v7547_v42 = vrot.slane %v6720_v5, %v6791_v8  ;;  %v3812_v17 = vcombine.high %v7457_v27, %v7448_v16 }
 0x121   : > { %3944 = vrot.lane.b32.xlu0 %v3897_v0, %s6743_s24  ;;  %3908 = vrot.lane.b32.xlu1 %v3828_v56, %s6741_s22  ;;  %v622_v54 = vsel %vm381_vm6, %v621_v32, %v7405_v34  ;;  %v3898_v0 = vcombine.high %v3894_v4, %v6735_v3  ;;  %v7551_v37 = vand.u32 4294901760, %v1116_v49  ;;  %v3829_v60 = vcombine.high %v3819_v41, %v6735_v3 }
 0x122   : > { %v754_v44 = vand.u32 4294901760, %v7492_v13  ;;  %v7557_v24 = vsub.f32 %v1110_v2, %v7518_v52  ;;  %v1113_v32 = vsel %vm637_vm8, %v384_v10, 0  ;;  %v4587_v16 = vcombine.high %v7532_v63, %v6735_v3 }
 0x123   : > { %v7513_v36 = vpop.permute.xlu0 %1792  ;;  %v587_v35 = vpop.permute.xlu1 %586  ;;  %v4556_v27 = vcombine.high %v7470_v1, %v7473_v9  ;;  %v4487_v50 = vcombine.low %v7544_v59, %v7547_v42  ;;  %v4540_v62 = vcombine.high %v6982_v20, %v6997_v29  ;;  %v7579_v1 = vsub.f32 %v1116_v49, %v7551_v37 }
 0x124   : > { %v755_v15 = vsub.f32 %v7492_v13, %v754_v44  ;;  %v623_v47 = vsel %vm383_vm7, %v622_v54, %v587_v35  ;;  %v7581_v9 = vand.u32 4294901760, %v1113_v32  ;;  %v3826_v5 = vrot.slane %v3812_v17, %v6887_v40 }
 0x125   : > { %3948 = vrot.lane.b32.xlu0 %v3894_v4, %s6744_s25  ;;  %v639_v34 = vsel %vm637_vm8, %v623_v47, 0  ;;  %3912 = vrot.lane.b32.xlu1 %v3819_v41, %s6742_s23  ;;  %v4524_v4 = vcombine.high %v6966_v12, %v6985_v21  ;;  %v1187_v30 = vand.u32 4294901760, %v7557_v24  ;;  %v4570_v12 = vrot.slane %v4556_v27, %v6887_v40  ;;  %v6725_v27 = vld [vmem:[%s6785_s17 + $0x1e] ss:$48 sps:$4 sm:$0xff]  }
 0x126   : > { %v756_v25 = vand.u32 4294901760, %v755_v15  ;;  %v7538_v18 = vand.u32 4294901760, %v639_v34  ;;  %v7595_v29 = vrot.slane %v4487_v50, %v6887_v40  ;;  %v7601_v35 = vrot.slane %v4540_v62, %v6791_v8 }
 0x127   : > { %v7540_v7 = vpop.permute.xlu0 %1796  ;;  %v7553_v56 = vpop.permute.xlu1 %1760  ;;  %v7604_v41 = vsub.f32 %v1113_v32, %v7581_v9  ;;  %v3830_v43 = vcombine.high %v3826_v5, %v6735_v3  ;;  %v1188_v49 = vsub.f32 %v7557_v24, %v1187_v30  ;;  %v1228_v47 = vand.u32 4294901760, %v7579_v1 }
 0x128   : > { %757 = vmatprep.subr.mxu1 %v756_v25  ;;  %v759_v55 = vsub.f32 %v639_v34, %v7538_v18  ;;  %677 = vmatpush1.msra.mxu0 %v7538_v18  ;;  %v4588_v10 = vcombine.high %v4570_v12, %v6735_v3  ;;  %v4519_v25 = vcombine.high %v7595_v29, %v6735_v3 }
 0x129   : > { %3952 = vrot.lane.b32.xlu0 %v3898_v0, %s6745_s26  ;;  %3916 = vrot.lane.b32.xlu1 %v3829_v60, %s6743_s24  ;;  %v4488_v0 = vcombine.high %v7544_v59, %v7547_v42  ;;  %v1234_v17 = vand.u32 4294901760, %v7604_v41  ;;  %v1189_v32 = vand.u32 4294901760, %v1188_v49 }
 0x12a   : > { %716 = vmatmul.mubr.f32.vlgmr.msra.gmra.mxu0 %v715_v11  ;;  %836 = vmatprep.subr.mxu0 %v7492_v13  ;;  %v760_v19 = vand.u32 4294901760, %v759_v55 }
 0x12b   : > { %v7569_v2 = vpop.permute.xlu0 %1800  ;;  %872 = vmatprep.mubr.f32.mxu0 %v6735_v3  ;;  %839 = vmatpush1.msra.mxu0 %v759_v55  ;;  %v7583_v13 = vpop.permute.xlu1 %1764 }
 0x12c   : > { %990 = vmatprep.subr.mxu0 %v754_v44  ;;  %v761_v54 = vsub.f32 %v759_v55, %v760_v19  ;;  %v7598_v44 = vrot.slane %v4524_v4, %v6791_v8  ;;  %v1229_v55 = vsub.f32 %v7579_v1, %v1228_v47  ;;  %v1235_v4 = vsub.f32 %v7604_v41, %v1234_v17 }
 0x12d   : > { %4620 = vrot.lane.b32.xlu0 %v4587_v16, %s6739_s20  ;;  %3920 = vrot.lane.b32.xlu1 %v3826_v5, %s6744_s25  ;;  %v6724_v16 = vld [vmem:[%s6785_s17 + $0x6] ss:$48 sps:$4 sm:$0xff]   ;;  %v5247_v5 = vcombine.low %v7248_v33, %v7263_v51 }
 0x12e   : > { %875 = vmatmul.mubr.f32.vlgmr.msra.gmra.mxu0 %v7445_v45  ;;  %v762_v21 = vand.u32 4294901760, %v761_v54  ;;  %v4571_v11 = vcombine.low %v7598_v44, %v7601_v35  ;;  %v1230_v50 = vand.u32 4294901760, %v1229_v55  ;;  %v7652_v62 = vrot.slane %v6724_v16, %v6791_v8  ;;  %v6667_v45 = vld [vmem:[%s8342_s1 + $0x10] sm:$0xff] }
 0x12f   : > { %994 = vmatpush1.msra.mxu0 %v760_v19  ;;  %v7591_v20 = vpop.permute.xlu0 %1804  ;;  %1027 = vmatprep.mubr.f32.mxu0 %v6735_v3  ;;  %v7607_v15 = vpop.permute.xlu1 %1768  ;;  %v4502_v19 = vrot.slane %v4488_v0, %v6887_v40  ;;  %v5263_v54 = vcombine.low %v7232_v58, %v7256_v6  ;;  %v5195_v55 = vcombine.low %v7297_v28, %v7312_v14 }
 0x130   : > { %1149 = vmatprep.subr.mxu0 %v7551_v37  ;;  %763 = vmatpush1.msra.mxu1 %v762_v21  ;;  %v4579_v42 = vrot.slane %v4571_v11, %v6887_v40  ;;  %v1822_v16 = vsel %vm371_vm0, %v7097_v23, %v7485_v22 }
 0x131   : > { %4624 = vrot.lane.b32.xlu0 %v4570_v12, %s6740_s21  ;;  %3924 = vrot.lane.b32.xlu1 %v3830_v43, %s6745_s26  ;;  %v4520_v12 = vcombine.high %v4502_v19, %v6735_v3  ;;  %v4572_v43 = vcombine.high %v7598_v44, %v7601_v35 }
 0x132   : > { %798 = vmatmul.mubr.f32.vlgmr.msra.gmra.mxu1 %v7419_v38  ;;  %912 = vmatprep.subr.mxu1 %v7479_v61 }
 0x133   : > { %1029 = vmatmul.mubr.f32.vlgmr.msra.gmra.mxu0 %v7419_v38  ;;  %v7620_v34 = vpop.permute.xlu0 %5885  ;;  %914 = vmatpush1.msra.mxu1 %v7538_v18  ;;  %v7631_v60 = vpop.permute.xlu1 %1772 }
 0x134   : > { %1151 = vmatpush1.msra.mxu0 %v7581_v9  ;;  %1066 = vmatprep.subr.mxu1 %v7479_v61 }
 0x135   : > { %1310 = vmatprep.subr.mxu0 %v7579_v1  ;;  %947 = vmatprep.mubr.f32.mxu1 %v6735_v3  ;;  %v7655_v1 = vrot.slane %v6725_v27, %v6791_v8  ;;  %v1823_v27 = vsel %vm373_vm2, %v1822_v16, %v7513_v36 }
 0x136   : > { %1184 = vmatprep.mubr.f32.mxu0 %v6735_v3  ;;  %4628 = vrot.lane.b32.xlu0 %v4588_v10, %s6741_s22  ;;  %v7682_v10 = vrot.slane %v5263_v54, %v6791_v8  ;;  %v1824_v23 = vsel %vm375_vm3, %v1823_v27, %v7540_v7  ;;  %v7742_v54 = vrot.slane %v5195_v55, %v6791_v8 }
 0x137   : > { %4592 = vrot.lane.b32.xlu1 %v4519_v25, %s6739_s20  ;;  %v7642_v59 = vpop.permute.xlu0 %5893  ;;  %951 = vmatmul.mubr.f32.vlgmr.msra.gmra.mxu1 %v713_v31  ;;  %v7648_v61 = vpop.permute.xlu1 %5881  ;;  %v4503_v49 = vcombine.low %v7652_v62, %v7655_v1  ;;  %v1832_v25 = vsel %vm633_vm1, %v6667_v45, 0  ;;  %v4504_v36 = vcombine.high %v7652_v62, %v7655_v1 }
 0x138   : > { %1190 = vmatmul.mubr.f32.vlgmr.msra.gmra.mxu0 %v1189_v32  ;;  %1068 = vmatpush1.msra.mxu1 %v7538_v18  ;;  %v1236_v18 = vand.u32 4294901760, %v1235_v4  ;;  %v7697_v0 = vand.u32 4294901760, %v1832_v25  ;;  %v5179_v32 = vcombine.low %v7302_v57, %v7321_v26  ;;  %v1825_v4 = vsel %vm377_vm4, %v1824_v23, %v7569_v2 }
 0x139   : > { %1313 = vmatpush1.msra.mxu0 %v7604_v41  ;;  %1231 = vmatprep.subr.mxu1 %v1230_v50  ;;  %v4589_v41 = vcombine.high %v4579_v42, %v6735_v3  ;;  %v4511_v11 = vrot.slane %v4503_v49, %v6887_v40  ;;  %v1826_v62 = vsel %vm379_vm5, %v1825_v4, %v7591_v20 }
 0x13a   : > { %1464 = vmatprep.subr.mxu0 %v1228_v47  ;;  %1101 = vmatprep.mubr.f32.mxu1 %v6735_v3  ;;  %v7679_v47 = vrot.slane %v5247_v5, %v6791_v8  ;;  %v7739_v5 = vrot.slane %v5179_v32, %v6791_v8  ;;  %v4518_v45 = vrot.slane %v4504_v36, %v6887_v40 }
 0x13b   : > { %1346 = vmatprep.mubr.f32.mxu0 %v6735_v3  ;;  %v1809_v31 = vpop.permute.xlu0 %1808  ;;  %4632 = vrot.lane.b32.xlu0 %v4579_v42, %s6742_s23  ;;  %v7671_v21 = vpop.permute.xlu1 %5889  ;;  %v4521_v50 = vcombine.high %v4511_v11, %v6735_v3  ;;  %v5180_v32 = vcombine.high %v7302_v57, %v7321_v26 }
 0x13c   : > { %4596 = vrot.lane.b32.xlu1 %v4502_v19, %s6740_s21  ;;  %1103 = vmatmul.mubr.f32.vlgmr.msra.gmra.mxu1 %v7419_v38  ;;  %v4586_v38 = vrot.slane %v4572_v43, %v6887_v40  ;;  %v5212_v23 = vcombine.high %v7739_v5, %v7742_v54 }
 0x13d   : > { %1349 = vmatmul.mubr.f32.vlgmr.msra.gmra.mxu0 %v7557_v24  ;;  %1237 = vmatpush1.msra.mxu1 %v1236_v18  ;;  %v1827_v24 = vsel %vm381_vm6, %v1826_v62, %v1809_v31  ;;  %v5264_v31 = vcombine.high %v7232_v58, %v7256_v6  ;;  %v1815_v58 = vsel %vm371_vm0, %v7126_v53, %v7553_v56 }
 0x13e   : > { %1468 = vmatpush1.msra.mxu0 %v1234_v17  ;;  %1386 = vmatprep.subr.mxu1 %v7551_v37  ;;  %v5279_v17 = vcombine.low %v7679_v47, %v7682_v10  ;;  %v4590_v19 = vcombine.high %v4586_v38, %v6735_v3  ;;  %v4522_v6 = vcombine.high %v4518_v45, %v6735_v3 }
 0x13f   : > { %1270 = vmatprep.mubr.f32.mxu1 %v6735_v3  ;;  %v7689_v44 = vpop.permute.xlu0 %5883  ;;  %4636 = vrot.lane.b32.xlu0 %v4589_v41, %s6743_s24  ;;  %v7693_v35 = vpop.permute.xlu1 %1776  ;;  %v5211_v41 = vcombine.low %v7739_v5, %v7742_v54  ;;  %v7790_v56 = vrot.slane %v5264_v31, %v6791_v8  ;;  %v5987_v54 = vcombine.low %v7620_v34, %v7642_v59 }
 0x140   : > { %4600 = vrot.lane.b32.xlu1 %v4520_v12, %s6741_s22  ;;  %1272 = vmatmul.mubr.f32.vlgmr.msra.gmra.mxu1 %v7518_v52  ;;  %v7735_v7 = vrot.slane %v5279_v17, %v6887_v40  ;;  %v5280_v12 = vcombine.high %v7679_v47, %v7682_v10 }
 0x141   : > { %1388 = vmatpush1.msra.mxu1 %v7581_v9  ;;  %1421 = vmatprep.mubr.f32.mxu1 %v6735_v3 }
 0x142   : > { %1540 = vmatprep.subr.mxu1 %v7551_v37  ;;  %1501 = vmatprep.mubr.f32.mxu0 %v6735_v3  ;;  %v7728_v37 = vsub.f32 %v1832_v25, %v7697_v0  ;;  %v5311_v49 = vcombine.high %v7735_v7, %v6735_v3  ;;  %v5294_v25 = vrot.slane %v5280_v12, %v6887_v40 }
 0x143   : > { %v7714_v42 = vpop.permute.xlu0 %5891  ;;  %4640 = vrot.lane.b32.xlu0 %v4586_v38, %s6744_s25  ;;  %v7723_v22 = vpop.permute.xlu1 %5879  ;;  %1503 = vmatmul.mubr.f32.vlgmr.msra.gmra.mxu0 %v7518_v52  ;;  %v5226_v12 = vrot.slane %v5212_v23, %v6887_v40 }
 0x144   : > { %4604 = vrot.lane.b32.xlu1 %v4511_v11, %s6742_s23  ;;  %1425 = vmatmul.mubr.f32.vlgmr.msra.gmra.mxu1 %v1187_v30  ;;  %v1909_v20 = vand.u32 4294901760, %v7728_v37  ;;  %v7799_v11 = vrot.slane %v5211_v41, %v6887_v40  ;;  %v5312_v26 = vcombine.high %v5294_v25, %v6735_v3 }
 0x145   : > { %1542 = vmatpush1.msra.mxu1 %v7581_v9  ;;  %1906 = vmatprep.mubr.f32.mxu0 %v6735_v3  ;;  %v5248_v9 = vcombine.high %v7248_v33, %v7263_v51  ;;  %v1816_v51 = vsel %vm373_vm2, %v1815_v58, %v7583_v13 }
 0x146   : > { %1575 = vmatprep.mubr.f32.mxu1 %v6735_v3  ;;  %v1910_v10 = vsub.f32 %v7728_v37, %v1909_v20  ;;  %v1817_v13 = vsel %vm375_vm3, %v1816_v51, %v7607_v15  ;;  %v5196_v15 = vcombine.high %v7297_v28, %v7312_v14  ;;  %v5243_v14 = vcombine.high %v7799_v11, %v6735_v3 }
 0x147   : > { %v1813_v2 = vpop.permute.xlu0 %1812  ;;  %4644 = vrot.lane.b32.xlu0 %v4590_v19, %s6745_s26  ;;  %v7753_v1 = vpop.permute.xlu1 %5887  ;;  %v7787_v53 = vrot.slane %v5248_v9, %v6791_v8  ;;  %v1818_v38 = vsel %vm377_vm4, %v1817_v13, %v7631_v60  ;;  %v6668_v9 = vld [vmem:[%s8342_s1 + $0x18] sm:$0xff]  ;;  %v5244_v13 = vcombine.high %v5226_v12, %v6735_v3 }
 0x148   : > { %4608 = vrot.lane.b32.xlu1 %v4521_v50, %s6743_s24  ;;  %v1828_v30 = vsel %vm383_vm7, %v1827_v24, %v1813_v2  ;;  %1577 = vmatmul.mubr.f32.vlgmr.msra.gmra.mxu1 %v7518_v52  ;;  %v1819_v55 = vsel %vm379_vm5, %v1818_v38, %v7693_v35  ;;  %v1911_v35 = vand.u32 4294901760, %v1910_v10  ;;  %v7822_v24 = vrot.slane %v5180_v32, %v6791_v8 }
 0x149   : > { %v1838_v18 = vsel %vm637_vm8, %v1828_v30, 0  ;;  %1992 = vmatprep.mubr.f32.mxu1 %v6735_v3  ;;  %v5295_v50 = vcombine.low %v7787_v53, %v7790_v56  ;;  %v7825_v2 = vrot.slane %v5196_v15, %v6791_v8  ;;  %v5971_v30 = vcombine.low %v7648_v61, %v7671_v21 }
 0x14a   : > { %v7767_v43 = vand.u32 4294901760, %v1838_v18 }
 0x14b   : > { %v7775_v33 = vpop.permute.xlu0 %2480  ;;  %5344 = vrot.lane.b32.xlu0 %v5311_v49, %s6739_s20  ;;  %v1781_v47 = vpop.permute.xlu1 %1780  ;;  %v5303_v31 = vrot.slane %v5295_v50, %v6887_v40  ;;  %v5296_v49 = vcombine.high %v7787_v53, %v7790_v56  ;;  %v5227_v51 = vcombine.low %v7822_v24, %v7825_v2  ;;  %v5228_v50 = vcombine.high %v7822_v24, %v7825_v2 }
 0x14c   : > { %v1949_v52 = vsub.f32 %v1838_v18, %v7767_v43  ;;  %4612 = vrot.lane.b32.xlu1 %v4518_v45, %s6744_s25  ;;  %1871 = vmatprep.subr.mxu0 %v7767_v43  ;;  %v1820_v27 = vsel %vm381_vm6, %v1819_v55, %v1781_v47  ;;  %v7856_v47 = vrot.slane %v5971_v30, %v6791_v8 }
 0x14d   : > { %v2514_v53 = vsel %vm371_vm0, %v7193_v46, %v7775_v33  ;;  %v5313_v56 = vcombine.high %v5303_v31, %v6735_v3  ;;  %v5310_v46 = vrot.slane %v5296_v49, %v6887_v40  ;;  %v5235_v15 = vrot.slane %v5227_v51, %v6887_v40 }
 0x14e   : > { %v1950_v17 = vand.u32 4294901760, %v1949_v52 }
 0x14f   : > { %v2485_v16 = vpop.permute.xlu0 %2484  ;;  %5348 = vrot.lane.b32.xlu0 %v5294_v25, %s6740_s21  ;;  %v1785_v60 = vpop.permute.xlu1 %1784 }
 0x150   : > { %4616 = vrot.lane.b32.xlu1 %v4522_v6, %s6745_s26  ;;  %v1951_v19 = vsub.f32 %v1949_v52, %v1950_v17  ;;  %v1821_v57 = vsel %vm383_vm7, %v1820_v27, %v1785_v60  ;;  %v2524_v6 = vsel %vm633_vm1, %v6668_v9, 0  ;;  %v2515_v55 = vsel %vm373_vm2, %v2514_v53, %v2485_v16 }
 0x151   : > { %v1835_v28 = vsel %vm637_vm8, %v1821_v57, 0  ;;  %v7865_v32 = vand.u32 4294901760, %v2524_v6  ;;  %v5919_v27 = vcombine.low %v7689_v44, %v7714_v42  ;;  %v5903_v60 = vcombine.low %v7723_v22, %v7753_v1 }
 0x152   : > { %v1952_v36 = vand.u32 4294901760, %v1951_v19  ;;  %v7819_v4 = vand.u32 4294901760, %v1835_v28 }
 0x153   : > { %v2489_v62 = vpop.permute.xlu0 %2488  ;;  %5352 = vrot.lane.b32.xlu0 %v5312_v26, %s6741_s22  ;;  %v7829_v5 = vpop.permute.xlu1 %2452  ;;  %v7883_v16 = vsub.f32 %v2524_v6, %v7865_v32 }
 0x154   : > { %5316 = vrot.lane.b32.xlu1 %v5243_v14, %s6739_s20  ;;  %v1955_v45 = vsub.f32 %v1835_v28, %v7819_v4  ;;  %1873 = vmatpush1.msra.mxu0 %v7819_v4  ;;  %v2516_v57 = vsel %vm375_vm3, %v2515_v55, %v2489_v62  ;;  %v5245_v14 = vcombine.high %v5235_v15, %v6735_v3 }
 0x155   : > { %1953 = vmatprep.subr.mxu1 %v1952_v36  ;;  %1912 = vmatmul.mubr.f32.vlgmr.msra.gmra.mxu0 %v1911_v35  ;;  %v5314_v35 = vcombine.high %v5310_v46, %v6735_v3  ;;  %v7899_v36 = vrot.slane %v5919_v27, %v6791_v8  ;;  %v7902_v62 = vrot.slane %v5903_v60, %v6791_v8  ;;  %v2601_v30 = vand.u32 4294901760, %v7883_v16 }
 0x156   : > { %2032 = vmatprep.subr.mxu0 %v1949_v52  ;;  %2068 = vmatprep.mubr.f32.mxu0 %v6735_v3  ;;  %v1956_v41 = vand.u32 4294901760, %v1955_v45  ;;  %v7853_v52 = vrot.slane %v5987_v54, %v6791_v8  ;;  %v5904_v27 = vcombine.high %v7723_v22, %v7753_v1 }
 0x157   : > { %2035 = vmatpush1.msra.mxu0 %v1955_v45  ;;  %v2493_v18 = vpop.permute.xlu0 %2492  ;;  %5356 = vrot.lane.b32.xlu0 %v5303_v31, %s6742_s23  ;;  %v7847_v58 = vpop.permute.xlu1 %2456  ;;  %v5242_v31 = vrot.slane %v5228_v50, %v6887_v40  ;;  %v2602_v49 = vsub.f32 %v7883_v16, %v2601_v30  ;;  %v5936_v50 = vcombine.high %v7902_v62, %v7899_v36 }
 0x158   : > { %5320 = vrot.lane.b32.xlu1 %v5226_v12, %s6740_s21  ;;  %2186 = vmatprep.subr.mxu0 %v1950_v17  ;;  %v1957_v10 = vsub.f32 %v1955_v45, %v1956_v41  ;;  %v6003_v33 = vcombine.low %v7856_v47, %v7853_v52  ;;  %v2517_v28 = vsel %vm377_vm4, %v2516_v57, %v2493_v18  ;;  %v8351_v12 = vld [vmem:[#allocation2_spill] sm:$0xff] }
 0x159   : > { %2071 = vmatmul.mubr.f32.vlgmr.msra.gmra.mxu0 %v7728_v37  ;;  %v5972_v45 = vcombine.high %v7648_v61, %v7671_v21  ;;  %v2507_v18 = vsel %vm371_vm0, %v8351_v12, %v7829_v5  ;;  %v2603_v55 = vand.u32 4294901760, %v2602_v49 }
 0x15a   : > { %2190 = vmatpush1.msra.mxu0 %v1956_v41  ;;  %v1958_v38 = vand.u32 4294901760, %v1957_v10  ;;  %2223 = vmatprep.mubr.f32.mxu0 %v6735_v3  ;;  %v7892_v23 = vrot.slane %v6003_v33, %v6887_v40 }
 0x15b   : > { %v2497_v25 = vpop.permute.xlu0 %2496  ;;  %5360 = vrot.lane.b32.xlu0 %v5313_v56, %s6743_s24  ;;  %v2461_v17 = vpop.permute.xlu1 %2460  ;;  %v7943_v6 = vrot.slane %v5972_v45, %v6791_v8 }
 0x15c   : > { %5324 = vrot.lane.b32.xlu1 %v5244_v13, %s6741_s22  ;;  %1959 = vmatpush1.msra.mxu1 %v1958_v38  ;;  %v2518_v24 = vsel %vm379_vm5, %v2517_v28, %v2497_v25  ;;  %v6035_v61 = vcombine.high %v7892_v23, %v6735_v3 }
 0x15d   : > { %1994 = vmatmul.mubr.f32.vlgmr.msra.gmra.mxu1 %v7697_v0  ;;  %2108 = vmatprep.subr.mxu1 %v7767_v43 }
 0x15e   : > { %2110 = vmatpush1.msra.mxu1 %v7819_v4  ;;  %2143 = vmatprep.mubr.f32.mxu1 %v6735_v3 }
 0x15f   : > { %v2501_v19 = vpop.permute.xlu0 %2500  ;;  %5364 = vrot.lane.b32.xlu0 %v5310_v46, %s6744_s25  ;;  %v2465_v26 = vpop.permute.xlu1 %2464  ;;  %2262 = vmatprep.subr.mxu1 %v7767_v43  ;;  %v5988_v43 = vcombine.high %v7620_v34, %v7642_v59  ;;  %v6004_v34 = vcombine.high %v7856_v47, %v7853_v52 }
 0x160   : > { %5328 = vrot.lane.b32.xlu1 %v5235_v15, %s6742_s23  ;;  %2225 = vmatmul.mubr.f32.vlgmr.msra.gmra.mxu0 %v7697_v0  ;;  %v2519_v2 = vsel %vm381_vm6, %v2518_v24, %v2501_v19  ;;  %v5920_v15 = vcombine.high %v7689_v44, %v7714_v42 }
 0x161   : > { %2147 = vmatmul.mubr.f32.vlgmr.msra.gmra.mxu1 %v1909_v20  ;;  %2598 = vmatprep.mubr.f32.mxu0 %v6735_v3  ;;  %v7931_v21 = vrot.slane %v5988_v43, %v6791_v8  ;;  %v6018_v47 = vrot.slane %v6004_v34, %v6887_v40 }
 0x162   : > { %2264 = vmatpush1.msra.mxu1 %v7819_v4  ;;  %2297 = vmatprep.mubr.f32.mxu1 %v6735_v3  ;;  %v5935_v4 = vcombine.low %v7902_v62, %v7899_v36  ;;  %v7985_v1 = vrot.slane %v5920_v15, %v6791_v8  ;;  %v7988_v36 = vrot.slane %v5904_v27, %v6791_v8 }
 0x163   : > { %v2505_v54 = vpop.permute.xlu0 %2504  ;;  %5368 = vrot.lane.b32.xlu0 %v5314_v35, %s6745_s26  ;;  %v2469_v20 = vpop.permute.xlu1 %2468  ;;  %v6019_v38 = vcombine.low %v7943_v6, %v7931_v21  ;;  %v6036_v19 = vcombine.high %v6018_v47, %v6735_v3  ;;  %v5950_v62 = vrot.slane %v5936_v50, %v6887_v40  ;;  %v6020_v8 = vcombine.high %v7943_v6, %v7931_v21 }
 0x164   : > { %5332 = vrot.lane.b32.xlu1 %v5245_v14, %s6743_s24  ;;  %v2520_v37 = vsel %vm383_vm7, %v2519_v2, %v2505_v54  ;;  %v7954_v10 = vrot.slane %v5935_v4, %v6887_v40  ;;  %v6669_v2 = vld [vmem:[%s8342_s1 + $0x20] sm:$0xff] }
 0x165   : > { %v2530_v59 = vsel %vm637_vm8, %v2520_v37, 0  ;;  %2299 = vmatmul.mubr.f32.vlgmr.msra.gmra.mxu1 %v7697_v0  ;;  %v2508_v0 = vsel %vm373_vm2, %v2507_v18, %v7847_v58  ;;  %v5246_v58 = vcombine.high %v5242_v31, %v6735_v3  ;;  %v6027_v22 = vrot.slane %v6019_v38, %v6887_v40  ;;  %v8352_v18 = vld [vmem:[#allocation3_spill] sm:$0xff] }
 0x166   : > { %v7924_v9 = vand.u32 4294901760, %v2530_v59  ;;  %2684 = vmatprep.mubr.f32.mxu1 %v6735_v3  ;;  %v2509_v52 = vsel %vm375_vm3, %v2508_v0, %v2461_v17  ;;  %v5951_v37 = vcombine.low %v7988_v36, %v7985_v1  ;;  %v5968_v34 = vcombine.high %v5950_v62, %v6735_v3 }
 0x167   : > { %v7936_v41 = vpop.permute.xlu0 %3204  ;;  %6068 = vrot.lane.b32.xlu0 %v6035_v61, %s6739_s20  ;;  %v2473_v5 = vpop.permute.xlu1 %2472  ;;  %v2510_v53 = vsel %vm377_vm4, %v2509_v52, %v2465_v26  ;;  %v5967_v26 = vcombine.high %v7954_v10, %v6735_v3  ;;  %v6034_v21 = vrot.slane %v6020_v8, %v6887_v40 }
 0x168   : > { %v2641_v51 = vsub.f32 %v2530_v59, %v7924_v9  ;;  %5336 = vrot.lane.b32.xlu1 %v5242_v31, %s6744_s25  ;;  %2563 = vmatprep.subr.mxu0 %v7924_v9  ;;  %v2511_v13 = vsel %vm379_vm5, %v2510_v53, %v2469_v20  ;;  %v6037_v20 = vcombine.high %v6027_v22, %v6735_v3  ;;  %v3248_v59 = vsel %vm633_vm1, %v6669_v2, 0 }
 0x169   : > { %v2512_v17 = vsel %vm381_vm6, %v2511_v13, %v2473_v5  ;;  %v8009_v12 = vand.u32 4294901760, %v3248_v59  ;;  %v3238_v49 = vsel %vm371_vm0, %v8352_v18, %v7936_v41  ;;  %v5959_v6 = vrot.slane %v5951_v37, %v6887_v40 }
 0x16a   : > { %v2642_v56 = vand.u32 4294901760, %v2641_v51 }
 0x16b   : > { %v3209_v25 = vpop.permute.xlu0 %3208  ;;  %6072 = vrot.lane.b32.xlu0 %v6018_v47, %s6740_s21  ;;  %v2477_v46 = vpop.permute.xlu1 %2476  ;;  %v6038_v47 = vcombine.high %v6034_v21, %v6735_v3  ;;  %v8028_v53 = vsub.f32 %v3248_v59, %v8009_v12  ;;  %v5969_v13 = vcombine.high %v5959_v6, %v6735_v3 }
 0x16c   : > { %5340 = vrot.lane.b32.xlu1 %v5246_v58, %s6745_s26  ;;  %v2643_v33 = vsub.f32 %v2641_v51, %v2642_v56  ;;  %v2513_v60 = vsel %vm383_vm7, %v2512_v17, %v2477_v46  ;;  %v3239_v0 = vsel %vm373_vm2, %v3238_v49, %v3209_v25  ;;  %v5952_v58 = vcombine.high %v7988_v36, %v7985_v1 }
 0x16d   : > { %v2527_v57 = vsel %vm637_vm8, %v2513_v60, 0 }
 0x16e   : > { %v2644_v35 = vand.u32 4294901760, %v2643_v33  ;;  %v7975_v28 = vand.u32 4294901760, %v2527_v57  ;;  %v3325_v33 = vand.u32 4294901760, %v8028_v53 }
 0x16f   : > { %v3213_v14 = vpop.permute.xlu0 %3212  ;;  %6076 = vrot.lane.b32.xlu0 %v6036_v19, %s6741_s22  ;;  %v7979_v44 = vpop.permute.xlu1 %3176 }
 0x170   : > { %6040 = vrot.lane.b32.xlu1 %v5967_v26, %s6739_s20  ;;  %v2647_v42 = vsub.f32 %v2527_v57, %v7975_v28  ;;  %2565 = vmatpush1.msra.mxu0 %v7975_v28  ;;  %v3240_v5 = vsel %vm375_vm3, %v3239_v0, %v3213_v14 }
 0x171   : > { %2645 = vmatprep.subr.mxu1 %v2644_v35  ;;  %2604 = vmatmul.mubr.f32.vlgmr.msra.gmra.mxu0 %v2603_v55  ;;  %v8353_v55 = vld [vmem:[#allocation4_spill] sm:$0xff]  ;;  %v3326_v35 = vsub.f32 %v8028_v53, %v3325_v33 }
 0x172   : > { %2724 = vmatprep.subr.mxu0 %v2641_v51  ;;  %2760 = vmatprep.mubr.f32.mxu0 %v6735_v3  ;;  %v2648_v43 = vand.u32 4294901760, %v2647_v42  ;;  %v3231_v15 = vsel %vm371_vm0, %v8353_v55, %v7979_v44  ;;  %v6587_v55 = vld [vmem:[%s8343_s2] sm:$0xff] }
 0x173   : > { %2727 = vmatpush1.msra.mxu0 %v2647_v42  ;;  %v3217_v24 = vpop.permute.xlu0 %3216  ;;  %6080 = vrot.lane.b32.xlu0 %v6027_v22, %s6742_s23  ;;  %v3181_v54 = vpop.permute.xlu1 %3180 }
 0x174   : > { %6044 = vrot.lane.b32.xlu1 %v5950_v62, %s6740_s21  ;;  %2878 = vmatprep.subr.mxu0 %v2642_v56  ;;  %v2649_v45 = vsub.f32 %v2647_v42, %v2648_v43  ;;  %v3241_v52 = vsel %vm377_vm4, %v3240_v5, %v3217_v24  ;;  %v3232_v60 = vsel %vm373_vm2, %v3231_v15, %v3181_v54  ;;  %v3327_v24 = vand.u32 4294901760, %v3326_v35 }
 0x175   : > { %2763 = vmatmul.mubr.f32.vlgmr.msra.gmra.mxu0 %v7883_v16 }
 0x176   : > { %2882 = vmatpush1.msra.mxu0 %v2648_v43  ;;  %v2650_v31 = vand.u32 4294901760, %v2649_v45  ;;  %2915 = vmatprep.mubr.f32.mxu0 %v6735_v3 }
 0x177   : > { %v3221_v4 = vpop.permute.xlu0 %3220  ;;  %6084 = vrot.lane.b32.xlu0 %v6037_v20, %s6743_s24  ;;  %v3185_v61 = vpop.permute.xlu1 %3184 }
 0x178   : > { %6048 = vrot.lane.b32.xlu1 %v5968_v34, %s6741_s22  ;;  %2651 = vmatpush1.msra.mxu1 %v2650_v31  ;;  %v3242_v56 = vsel %vm379_vm5, %v3241_v52, %v3221_v4  ;;  %v6670_v34 = vld [vmem:[%s8342_s1 + $0x28] sm:$0xff]  ;;  %s6676_s22 = sshll.u32 %s8383_s13, 4 }
 0x179   : > { %2686 = vmatmul.mubr.f32.vlgmr.msra.gmra.mxu1 %v7865_v32  ;;  %2800 = vmatprep.subr.mxu1 %v7924_v9 }
 0x17a   : > { %2802 = vmatpush1.msra.mxu1 %v7975_v28  ;;  %2835 = vmatprep.mubr.f32.mxu1 %v6735_v3 }
 0x17b   : > { %v3225_v51 = vpop.permute.xlu0 %3224  ;;  %6088 = vrot.lane.b32.xlu0 %v6034_v21, %s6744_s25  ;;  %v3189_v41 = vpop.permute.xlu1 %3188  ;;  %2954 = vmatprep.subr.mxu1 %v7924_v9 }
 0x17c   : > { %6052 = vrot.lane.b32.xlu1 %v5959_v6, %s6742_s23  ;;  %2917 = vmatmul.mubr.f32.vlgmr.msra.gmra.mxu0 %v7865_v32  ;;  %v3243_v9 = vsel %vm381_vm6, %v3242_v56, %v3225_v51 }
 0x17d   : > { %2839 = vmatmul.mubr.f32.vlgmr.msra.gmra.mxu1 %v2601_v30  ;;  %3322 = vmatprep.mubr.f32.mxu0 %v6735_v3  ;;  %v5966_v30 = vrot.slane %v5952_v58, %v6887_v40  ;;  %v3233_v40 = vsel %vm375_vm3, %v3232_v60, %v3185_v61  ;;  %v3972_v61 = vsel %vm633_vm1, %v6670_v34, 0 }
 0x17e   : > { %2956 = vmatpush1.msra.mxu1 %v7975_v28  ;;  %2989 = vmatprep.mubr.f32.mxu1 %v6735_v3  ;;  %v3234_v57 = vsel %vm377_vm4, %v3233_v40, %v3189_v41  ;;  %v8074_v49 = vand.u32 4294901760, %v3972_v61 }
 0x17f   : > { %v3229_v25 = vpop.permute.xlu0 %3228  ;;  %6092 = vrot.lane.b32.xlu0 %v6038_v47, %s6745_s26  ;;  %v3193_v17 = vpop.permute.xlu1 %3192 }
 0x180   : > { %6056 = vrot.lane.b32.xlu1 %v5969_v13, %s6743_s24  ;;  %v3244_v38 = vsel %vm383_vm7, %v3243_v9, %v3229_v25  ;;  %v3235_v28 = vsel %vm379_vm5, %v3234_v57, %v3193_v17  ;;  %v8086_v52 = vsub.f32 %v3972_v61, %v8074_v49 }
 0x181   : > { %v3254_v46 = vsel %vm637_vm8, %v3244_v38, 0  ;;  %2991 = vmatmul.mubr.f32.vlgmr.msra.gmra.mxu1 %v7865_v32  ;;  %v5970_v32 = vcombine.high %v5966_v30, %v6735_v3 }
 0x182   : > { %v3286_v16 = vand.u32 4294901760, %v3254_v46  ;;  %3408 = vmatprep.mubr.f32.mxu1 %v6735_v3  ;;  %v4049_v38 = vand.u32 4294901760, %v8086_v52 }
 0x183   : > { %v3929_v27 = vpop.permute.xlu0 %3928  ;;  %v3197_v50 = vpop.permute.xlu1 %3196 }
 0x184   : > { %v3365_v19 = vsub.f32 %v3254_v46, %v3286_v16  ;;  %6060 = vrot.lane.b32.xlu1 %v5966_v30, %s6744_s25  ;;  %3287 = vmatprep.subr.mxu0 %v3286_v16  ;;  %v3236_v44 = vsel %vm381_vm6, %v3235_v28, %v3197_v50  ;;  %v3962_v18 = vsel %vm371_vm0, %v7361_v48, %v3929_v27  ;;  %s170_s25 = scalar_lea.vmem %s8344_s3, %s6676_s22 }
 0x185   : > { %v4050_v27 = vsub.f32 %v8086_v52, %v4049_v38 }
 0x186   : > { %v3366_v26 = vand.u32 4294901760, %v3365_v19 }
 0x187   : > { %v3933_v14 = vpop.permute.xlu0 %3932  ;;  %v3201_v42 = vpop.permute.xlu1 %3200  ;;  %v4051_v28 = vand.u32 4294901760, %v4050_v27 }
 0x188   : > { %6064 = vrot.lane.b32.xlu1 %v5970_v32, %s6745_s26  ;;  %v3367_v22 = vsub.f32 %v3365_v19, %v3366_v26  ;;  %v3237_v1 = vsel %vm383_vm7, %v3236_v44, %v3201_v42  ;;  %v3963_v6 = vsel %vm373_vm2, %v3962_v18, %v3933_v14 }
 0x189   : > { %v3251_v36 = vsel %vm637_vm8, %v3237_v1, 0 }
 0x18a   : > { %v3368_v62 = vand.u32 4294901760, %v3367_v22  ;;  %v3288_v43 = vand.u32 4294901760, %v3251_v36 }
 0x18b   : > { %v3937_v2 = vpop.permute.xlu0 %3936  ;;  %v3901_v54 = vpop.permute.xlu1 %3900 }
 0x18c   : > { %3369 = vmatprep.subr.mxu1 %v3368_v62  ;;  %v3371_v8 = vsub.f32 %v3251_v36, %v3288_v43  ;;  %3289 = vmatpush1.msra.mxu0 %v3288_v43  ;;  %v3964_v51 = vsel %vm375_vm3, %v3963_v6, %v3937_v2 }
 0x18d   : > { %3328 = vmatmul.mubr.f32.vlgmr.msra.gmra.mxu0 %v3327_v24  ;;  %3448 = vmatprep.subr.mxu0 %v3365_v19 }
 0x18e   : > { %3451 = vmatpush1.msra.mxu0 %v3371_v8  ;;  %3484 = vmatprep.mubr.f32.mxu0 %v6735_v3  ;;  %v3372_v37 = vand.u32 4294901760, %v3371_v8 }
 0x18f   : > { %v3941_v45 = vpop.permute.xlu0 %3940  ;;  %3602 = vmatprep.subr.mxu0 %v3366_v26  ;;  %v3905_v20 = vpop.permute.xlu1 %3904 }
 0x190   : > { %v3373_v59 = vsub.f32 %v3371_v8, %v3372_v37  ;;  %v3965_v41 = vsel %vm377_vm4, %v3964_v51, %v3941_v45 }
 0x191   : > { %3487 = vmatmul.mubr.f32.vlgmr.msra.gmra.mxu0 %v8028_v53  ;;  %v3955_v53 = vsel %vm371_vm0, %v7409_v39, %v3901_v54  ;;  %v6746_v39 = vmov 0  }
 0x192   : > { %3606 = vmatpush1.msra.mxu0 %v3372_v37  ;;  %v3374_v31 = vand.u32 4294901760, %v3373_v59  ;;  %3639 = vmatprep.mubr.f32.mxu0 %v6735_v3  ;;  %v3956_v46 = vsel %vm373_vm2, %v3955_v53, %v3905_v20 }
 0x193   : > { %v3945_v4 = vpop.permute.xlu0 %3944  ;;  %v3909_v21 = vpop.permute.xlu1 %3908  ;;  %6699 = vset.pattern.permute.xlu0 %v6746_v39 }
 0x194   : > { %3375 = vmatpush1.msra.mxu1 %v3374_v31  ;;  %v3966_v48 = vsel %vm379_vm5, %v3965_v41, %v3945_v4  ;;  %6590 = vperm.xlu0 %6699, %v6587_v55  }
 0x195   : > { %3410 = vmatmul.mubr.f32.vlgmr.msra.gmra.mxu1 %v8009_v12  ;;  %3524 = vmatprep.subr.mxu1 %v3286_v16 }
 0x196   : > { %3526 = vmatpush1.msra.mxu1 %v3288_v43  ;;  %3559 = vmatprep.mubr.f32.mxu1 %v6735_v3 }
 0x197   : > { %v3949_v0 = vpop.permute.xlu0 %3948  ;;  %3678 = vmatprep.subr.mxu1 %v3286_v16  ;;  %v3913_v5 = vpop.permute.xlu1 %3912  ;;  %3641 = vmatmul.mubr.f32.vlgmr.msra.gmra.mxu0 %v8009_v12 }
 0x198   : > { %4046 = vmatprep.mubr.f32.mxu0 %v6735_v3  ;;  %v3967_v47 = vsel %vm381_vm6, %v3966_v48, %v3949_v0 }
 0x199   : > { %3563 = vmatmul.mubr.f32.vlgmr.msra.gmra.mxu1 %v3325_v33  ;;  %v3957_v33 = vsel %vm375_vm3, %v3956_v46, %v3909_v21 }
 0x19a   : > { %3680 = vmatpush1.msra.mxu1 %v3288_v43  ;;  %3713 = vmatprep.mubr.f32.mxu1 %v6735_v3  ;;  %v3958_v15 = vsel %vm377_vm4, %v3957_v33, %v3913_v5  ;;  %v6671_v43 = vld [vmem:[%s8342_s1 + $0x30] sm:$0xff] }
 0x19b   : > { %v3953_v58 = vpop.permute.xlu0 %3952  ;;  %v3917_v13 = vpop.permute.xlu1 %3916  ;;  %v4664_v8 = vsel %vm633_vm1, %v6671_v43, 0 }
 0x19c   : > { %v3968_v56 = vsel %vm383_vm7, %v3967_v47, %v3953_v58  ;;  %v3959_v60 = vsel %vm379_vm5, %v3958_v15, %v3917_v13  ;;  %v8121_v34 = vand.u32 4294901760, %v4664_v8 }
 0x19d   : > { %v3978_v9 = vsel %vm637_vm8, %v3968_v56, 0  ;;  %3715 = vmatmul.mubr.f32.vlgmr.msra.gmra.mxu1 %v8009_v12 }
 0x19e   : > { %v4010_v25 = vand.u32 4294901760, %v3978_v9  ;;  %4132 = vmatprep.mubr.f32.mxu1 %v6735_v3  ;;  %v8128_v61 = vsub.f32 %v4664_v8, %v8121_v34 }
 0x19f   : > { %v4621_v17 = vpop.permute.xlu0 %4620  ;;  %v3921_v30 = vpop.permute.xlu1 %3920 }
 0x1a0   : > { %v4089_v16 = vsub.f32 %v3978_v9, %v4010_v25  ;;  %4011 = vmatprep.subr.mxu0 %v4010_v25  ;;  %v3960_v50 = vsel %vm381_vm6, %v3959_v60, %v3921_v30  ;;  %v4654_v54 = vsel %vm371_vm0, %v7532_v63, %v4621_v17  ;;  %v4741_v41 = vand.u32 4294901760, %v8128_v61 }
 0x1a2   : > { %v4090_v12 = vand.u32 4294901760, %v4089_v16 }
 0x1a3   : > { %v4625_v19 = vpop.permute.xlu0 %4624  ;;  %v3925_v40 = vpop.permute.xlu1 %3924 }
 0x1a4   : > { %v4091_v57 = vsub.f32 %v4089_v16, %v4090_v12  ;;  %v3961_v32 = vsel %vm383_vm7, %v3960_v50, %v3925_v40  ;;  %v4655_v20 = vsel %vm373_vm2, %v4654_v54, %v4625_v19 }
 0x1a5   : > { %v3975_v26 = vsel %vm637_vm8, %v3961_v32, 0 }
 0x1a6   : > { %v4092_v35 = vand.u32 4294901760, %v4091_v57  ;;  %v4012_v14 = vand.u32 4294901760, %v3975_v26  ;;  %v6672_v57 = vld [vmem:[%s8342_s1 + $0x38] sm:$0xff] }
 0x1a8   : > { %4093 = vmatprep.subr.mxu1 %v4092_v35  ;;  %v4095_v44 = vsub.f32 %v3975_v26, %v4012_v14  ;;  %v4629_v42 = vpop.permute.xlu0 %4628  ;;  %4013 = vmatpush1.msra.mxu0 %v4012_v14  ;;  %v5388_v35 = vsel %vm633_vm1, %v6672_v57, 0 }
 0x1a9   : > { %v4593_v22 = vpop.permute.xlu1 %4592  ;;  %4052 = vmatmul.mubr.f32.vlgmr.msra.gmra.mxu0 %v4051_v28  ;;  %4172 = vmatprep.subr.mxu0 %v4089_v16  ;;  %v4656_v4 = vsel %vm375_vm3, %v4655_v20, %v4629_v42 }
 0x1aa   : > { %4175 = vmatpush1.msra.mxu0 %v4095_v44  ;;  %4208 = vmatprep.mubr.f32.mxu0 %v6735_v3  ;;  %v4096_v1 = vand.u32 4294901760, %v4095_v44  ;;  %v4647_v48 = vsel %vm371_vm0, %v7595_v29, %v4593_v22 }
 0x1ab   : > { %4326 = vmatprep.subr.mxu0 %v4090_v12 }
 0x1ac   : > { %v4097_v36 = vsub.f32 %v4095_v44, %v4096_v1  ;;  %v8155_v44 = vand.u32 4294901760, %v5388_v35 }
 0x1ad   : > { %v4633_v62 = vpop.permute.xlu0 %4632  ;;  %4211 = vmatmul.mubr.f32.vlgmr.msra.gmra.mxu0 %v8086_v52 }
 0x1ae   : > { %v4597_v24 = vpop.permute.xlu1 %4596  ;;  %4330 = vmatpush1.msra.mxu0 %v4096_v1  ;;  %v4098_v2 = vand.u32 4294901760, %v4097_v36  ;;  %4363 = vmatprep.mubr.f32.mxu0 %v6735_v3  ;;  %v4657_v31 = vsel %vm377_vm4, %v4656_v4, %v4633_v62  ;;  %v8166_v43 = vsub.f32 %v5388_v35, %v8155_v44 }
 0x1af   : > { %v4648_v47 = vsel %vm373_vm2, %v4647_v48, %v4597_v24 }
 0x1b0   : > { %4099 = vmatpush1.msra.mxu1 %v4098_v2  ;;  %v5465_v20 = vand.u32 4294901760, %v8166_v43 }
 0x1b1   : > { %v4637_v45 = vpop.permute.xlu0 %4636  ;;  %4134 = vmatmul.mubr.f32.vlgmr.msra.gmra.mxu1 %v8074_v49  ;;  %4248 = vmatprep.subr.mxu1 %v4010_v25 }
 0x1b2   : > { %v4601_v37 = vpop.permute.xlu1 %4600  ;;  %4250 = vmatpush1.msra.mxu1 %v4012_v14  ;;  %4283 = vmatprep.mubr.f32.mxu1 %v6735_v3  ;;  %v4658_v21 = vsel %vm379_vm5, %v4657_v31, %v4637_v45 }
 0x1b3   : > { %4402 = vmatprep.subr.mxu1 %v4010_v25  ;;  %4365 = vmatmul.mubr.f32.vlgmr.msra.gmra.mxu0 %v8074_v49  ;;  %v4649_v13 = vsel %vm375_vm3, %v4648_v47, %v4601_v37  ;;  %v4742_v25 = vsub.f32 %v8128_v61, %v4741_v41 }
 0x1b4   : > { %4738 = vmatprep.mubr.f32.mxu0 %v6735_v3 }
 0x1b5   : > { %v4641_v63 = vpop.permute.xlu0 %4640  ;;  %4287 = vmatmul.mubr.f32.vlgmr.msra.gmra.mxu1 %v4049_v38  ;;  %v4743_v55 = vand.u32 4294901760, %v4742_v25 }
 0x1b6   : > { %v4605_v59 = vpop.permute.xlu1 %4604  ;;  %4404 = vmatpush1.msra.mxu1 %v4012_v14  ;;  %4437 = vmatprep.mubr.f32.mxu1 %v6735_v3  ;;  %v4659_v18 = vsel %vm381_vm6, %v4658_v21, %v4641_v63 }
 0x1b9   : > { %v4645_v6 = vpop.permute.xlu0 %4644  ;;  %4439 = vmatmul.mubr.f32.vlgmr.msra.gmra.mxu1 %v8074_v49  ;;  %v4650_v49 = vsel %vm377_vm4, %v4649_v13, %v4605_v59 }
 0x1ba   : > { %v4609_v0 = vpop.permute.xlu1 %4608  ;;  %v4660_v51 = vsel %vm383_vm7, %v4659_v18, %v4645_v6  ;;  %4824 = vmatprep.mubr.f32.mxu1 %v6735_v3 }
 0x1bb   : > { %v4670_v5 = vsel %vm637_vm8, %v4660_v51, 0  ;;  %v4651_v38 = vsel %vm379_vm5, %v4650_v49, %v4609_v0 }
 0x1bc   : > { %v4702_v52 = vand.u32 4294901760, %v4670_v5 }
 0x1bd   : > { %v5345_v58 = vpop.permute.xlu0 %5344 }
 0x1be   : > { %v4613_v56 = vpop.permute.xlu1 %4612  ;;  %v4781_v9 = vsub.f32 %v4670_v5, %v4702_v52  ;;  %4703 = vmatprep.subr.mxu0 %v4702_v52  ;;  %v5378_v42 = vsel %vm371_vm0, %v7735_v7, %v5345_v58 }
 0x1bf   : > { %v4652_v17 = vsel %vm381_vm6, %v4651_v38, %v4613_v56 }
 0x1c0   : > { %v4782_v53 = vand.u32 4294901760, %v4781_v9 }
 0x1c1   : > { %v5349_v46 = vpop.permute.xlu0 %5348 }
 0x1c2   : > { %v4617_v29 = vpop.permute.xlu1 %4616  ;;  %v4783_v30 = vsub.f32 %v4781_v9, %v4782_v53  ;;  %v5379_v22 = vsel %vm373_vm2, %v5378_v42, %v5349_v46  ;;  %v6673_v46 = vld [vmem:[%s8342_s1 + $0x40] sm:$0xff] }
 0x1c3   : > { %v4653_v16 = vsel %vm383_vm7, %v4652_v17, %v4617_v29 }
 0x1c4   : > { %v4667_v33 = vsel %vm637_vm8, %v4653_v16, 0  ;;  %v4784_v12 = vand.u32 4294901760, %v4783_v30  ;;  %v6112_v30 = vsel %vm633_vm1, %v6673_v46, 0 }
 0x1c5   : > { %v4704_v15 = vand.u32 4294901760, %v4667_v33  ;;  %v5353_v27 = vpop.permute.xlu0 %5352 }
 0x1c6   : > { %v5317_v39 = vpop.permute.xlu1 %5316  ;;  %4785 = vmatprep.subr.mxu1 %v4784_v12  ;;  %v5380_v62 = vsel %vm375_vm3, %v5379_v22, %v5353_v27  ;;  %v8196_v12 = vand.u32 4294901760, %v6112_v30 }
 0x1c7   : > { %v4787_v60 = vsub.f32 %v4667_v33, %v4704_v15  ;;  %4705 = vmatpush1.msra.mxu0 %v4704_v15  ;;  %v5371_v63 = vsel %vm371_vm0, %v7799_v11, %v5317_v39 }
 0x1c8   : > { %4744 = vmatmul.mubr.f32.vlgmr.msra.gmra.mxu0 %v4743_v55  ;;  %4864 = vmatprep.subr.mxu0 %v4781_v9 }
 0x1c9   : > { %4867 = vmatpush1.msra.mxu0 %v4787_v60  ;;  %4900 = vmatprep.mubr.f32.mxu0 %v6735_v3  ;;  %v4788_v19 = vand.u32 4294901760, %v4787_v60  ;;  %v5357_v50 = vpop.permute.xlu0 %5356 }
 0x1ca   : > { %5018 = vmatprep.subr.mxu0 %v4782_v53  ;;  %v5321_v40 = vpop.permute.xlu1 %5320  ;;  %v5381_v24 = vsel %vm377_vm4, %v5380_v62, %v5357_v50 }
 0x1cb   : > { %v4789_v32 = vsub.f32 %v4787_v60, %v4788_v19  ;;  %v5372_v4 = vsel %vm373_vm2, %v5371_v63, %v5321_v40 }
 0x1cc   : > { %4903 = vmatmul.mubr.f32.vlgmr.msra.gmra.mxu0 %v8128_v61 }
 0x1cd   : > { %5022 = vmatpush1.msra.mxu0 %v4788_v19  ;;  %v4790_v26 = vand.u32 4294901760, %v4789_v32  ;;  %5055 = vmatprep.mubr.f32.mxu0 %v6735_v3  ;;  %v5361_v28 = vpop.permute.xlu0 %5360 }
 0x1ce   : > { %v5325_v14 = vpop.permute.xlu1 %5324  ;;  %v5382_v7 = vsel %vm379_vm5, %v5381_v24, %v5361_v28 }
 0x1cf   : > { %4791 = vmatpush1.msra.mxu1 %v4790_v26  ;;  %v5373_v21 = vsel %vm375_vm3, %v5372_v4, %v5325_v14 }
 0x1d0   : > { %4826 = vmatmul.mubr.f32.vlgmr.msra.gmra.mxu1 %v8121_v34  ;;  %4940 = vmatprep.subr.mxu1 %v4702_v52 }
 0x1d1   : > { %4942 = vmatpush1.msra.mxu1 %v4704_v15  ;;  %4975 = vmatprep.mubr.f32.mxu1 %v6735_v3  ;;  %v5365_v1 = vpop.permute.xlu0 %5364 }
 0x1d2   : > { %5094 = vmatprep.subr.mxu1 %v4702_v52  ;;  %v5329_v36 = vpop.permute.xlu1 %5328  ;;  %5057 = vmatmul.mubr.f32.vlgmr.msra.gmra.mxu0 %v8121_v34  ;;  %v5383_v2 = vsel %vm381_vm6, %v5382_v7, %v5365_v1 }
 0x1d3   : > { %5462 = vmatprep.mubr.f32.mxu0 %v6735_v3  ;;  %v5374_v6 = vsel %vm377_vm4, %v5373_v21, %v5329_v36 }
 0x1d4   : > { %4979 = vmatmul.mubr.f32.vlgmr.msra.gmra.mxu1 %v4741_v41 }
 0x1d5   : > { %5096 = vmatpush1.msra.mxu1 %v4704_v15  ;;  %5129 = vmatprep.mubr.f32.mxu1 %v6735_v3  ;;  %v5369_v54 = vpop.permute.xlu0 %5368 }
 0x1d6   : > { %v5333_v8 = vpop.permute.xlu1 %5332  ;;  %v5384_v45 = vsel %vm383_vm7, %v5383_v2, %v5369_v54 }
 0x1d7   : > { %v5394_v37 = vsel %vm637_vm8, %v5384_v45, 0  ;;  %v5375_v0 = vsel %vm379_vm5, %v5374_v6, %v5333_v8 }
 0x1d8   : > { %5131 = vmatmul.mubr.f32.vlgmr.msra.gmra.mxu1 %v8121_v34  ;;  %v5426_v59 = vand.u32 4294901760, %v5394_v37  ;;  %v5466_v34 = vsub.f32 %v8166_v43, %v5465_v20 }
 0x1d9   : > { %5548 = vmatprep.mubr.f32.mxu1 %v6735_v3  ;;  %v6069_v31 = vpop.permute.xlu0 %6068 }
 0x1da   : > { %v5337_v61 = vpop.permute.xlu1 %5336  ;;  %v5505_v18 = vsub.f32 %v5394_v37, %v5426_v59  ;;  %5427 = vmatprep.subr.mxu0 %v5426_v59  ;;  %v5467_v58 = vand.u32 4294901760, %v5466_v34  ;;  %v6102_v27 = vsel %vm371_vm0, %v7892_v23, %v6069_v31  ;;  %v8209_v23 = vsub.f32 %v6112_v30, %v8196_v12 }
 0x1db   : > { %v5376_v51 = vsel %vm381_vm6, %v5375_v0, %v5337_v61 }
 0x1dc   : > { %v5506_v11 = vand.u32 4294901760, %v5505_v18  ;;  %v6189_v24 = vand.u32 4294901760, %v8209_v23 }
 0x1dd   : > { %v6073_v5 = vpop.permute.xlu0 %6072 }
 0x1de   : > { %v5341_v41 = vpop.permute.xlu1 %5340  ;;  %v5507_v52 = vsub.f32 %v5505_v18, %v5506_v11  ;;  %v6103_v60 = vsel %vm373_vm2, %v6102_v27, %v6073_v5 }
 0x1df   : > { %v5377_v48 = vsel %vm383_vm7, %v5376_v51, %v5341_v41 }
 0x1e0   : > { %v5391_v47 = vsel %vm637_vm8, %v5377_v48, 0  ;;  %v5508_v13 = vand.u32 4294901760, %v5507_v52 }
 0x1e1   : > { %v5428_v56 = vand.u32 4294901760, %v5391_v47  ;;  %v6077_v9 = vpop.permute.xlu0 %6076 }
 0x1e2   : > { %v6041_v49 = vpop.permute.xlu1 %6040  ;;  %5509 = vmatprep.subr.mxu1 %v5508_v13  ;;  %v6104_v40 = vsel %vm375_vm3, %v6103_v60, %v6077_v9 }
 0x1e3   : > { %v5511_v25 = vsub.f32 %v5391_v47, %v5428_v56  ;;  %5429 = vmatpush1.msra.mxu0 %v5428_v56  ;;  %v6095_v7 = vsel %vm371_vm0, %v7954_v10, %v6041_v49  ;;  %v6190_v10 = vsub.f32 %v8209_v23, %v6189_v24 }
 0x1e4   : > { %5468 = vmatmul.mubr.f32.vlgmr.msra.gmra.mxu0 %v5467_v58  ;;  %5588 = vmatprep.subr.mxu0 %v5505_v18 }
 0x1e5   : > { %5591 = vmatpush1.msra.mxu0 %v5511_v25  ;;  %5624 = vmatprep.mubr.f32.mxu0 %v6735_v3  ;;  %v5512_v38 = vand.u32 4294901760, %v5511_v25  ;;  %v6081_v53 = vpop.permute.xlu0 %6080 }
 0x1e6   : > { %5742 = vmatprep.subr.mxu0 %v5506_v11  ;;  %v6045_v17 = vpop.permute.xlu1 %6044  ;;  %v6105_v32 = vsel %vm377_vm4, %v6104_v40, %v6081_v53 }
 0x1e7   : > { %v5513_v29 = vsub.f32 %v5511_v25, %v5512_v38  ;;  %v6096_v45 = vsel %vm373_vm2, %v6095_v7, %v6045_v17 }
 0x1e8   : > { %5627 = vmatmul.mubr.f32.vlgmr.msra.gmra.mxu0 %v8166_v43 }
 0x1e9   : > { %5746 = vmatpush1.msra.mxu0 %v5512_v38  ;;  %v5514_v16 = vand.u32 4294901760, %v5513_v29  ;;  %5779 = vmatprep.mubr.f32.mxu0 %v6735_v3  ;;  %v6085_v33 = vpop.permute.xlu0 %6084 }
 0x1ea   : > { %v6049_v55 = vpop.permute.xlu1 %6048  ;;  %v717_v15 = vpop.f32.mrf.mxu0  ;;  %v6106_v26 = vsel %vm379_vm5, %v6105_v32, %v6085_v33 }
 0x1eb   : > { %5515 = vmatpush1.msra.mxu1 %v5514_v16 }
 0x1ec   : > { %5550 = vmatmul.mubr.f32.vlgmr.msra.gmra.mxu1 %v8155_v44  ;;  %5664 = vmatprep.subr.mxu1 %v5426_v59  ;;  %v719_v39 = vpop.f32.mrf.mxu0 }
 0x1ed   : > { %5666 = vmatpush1.msra.mxu1 %v5428_v56  ;;  %5699 = vmatprep.mubr.f32.mxu1 %v6735_v3  ;;  %v6089_v19 = vpop.permute.xlu0 %6088 }
 0x1ee   : > { %5818 = vmatprep.subr.mxu1 %v5426_v59  ;;  %v6053_v50 = vpop.permute.xlu1 %6052  ;;  %5781 = vmatmul.mubr.f32.vlgmr.msra.gmra.mxu0 %v8155_v44  ;;  %v876_v57 = vpop.f32.mrf.mxu0  ;;  %v6107_v28 = vsel %vm381_vm6, %v6106_v26, %v6089_v19  ;;  %v6097_v59 = vsel %vm375_vm3, %v6096_v45, %v6049_v55 }
 0x1ef   : > { %6186 = vmatprep.mubr.f32.mxu0 %v6735_v3  ;;  %v6098_v4 = vsel %vm377_vm4, %v6097_v59, %v6053_v50 }
 0x1f0   : > { %5703 = vmatmul.mubr.f32.vlgmr.msra.gmra.mxu1 %v5465_v20  ;;  %v878_v35 = vpop.f32.mrf.mxu0 }
 0x1f1   : > { %5820 = vmatpush1.msra.mxu1 %v5428_v56  ;;  %5853 = vmatprep.mubr.f32.mxu1 %v6735_v3  ;;  %v6093_v14 = vpop.permute.xlu0 %6092  ;;  %v6191_v56 = vand.u32 4294901760, %v6190_v10 }
 0x1f2   : > { %v6057_v42 = vpop.permute.xlu1 %6056  ;;  %v6108_v22 = vsel %vm383_vm7, %v6107_v28, %v6093_v14  ;;  %v799_v1 = vpop.f32.mrf.mxu1 }
 0x1f3   : > { %v1030_v36 = vpop.f32.mrf.mxu0  ;;  %v6118_v62 = vsel %vm637_vm8, %v6108_v22, 0  ;;  %v800_v43 = vadd.f32 %v799_v1, %v717_v15  ;;  %v6099_v18 = vsel %vm379_vm5, %v6098_v4, %v6057_v42 }
 0x1f4   : > { %5855 = vmatmul.mubr.f32.vlgmr.msra.gmra.mxu1 %v8155_v44  ;;  %v8220_v2 = vand.u32 4294901760, %v6118_v62  ;;  %v801_v54 = vpop.f32.mrf.mxu1 }
 0x1f5   : > { %6272 = vmatprep.mubr.f32.mxu1 %v6735_v3  ;;  %v1032_v8 = vpop.f32.mrf.mxu0  ;;  %v802_v20 = vadd.f32 %v801_v54, %v719_v39  ;;  %v877_v63 = vadd.f32 %v876_v57, %v800_v43 }
 0x1f6   : > { %v6061_v37 = vpop.permute.xlu1 %6060  ;;  %v6229_v44 = vsub.f32 %v6118_v62, %v8220_v2  ;;  %6151 = vmatprep.subr.mxu0 %v8220_v2 }
 0x1f7   : > { %v879_v31 = vadd.f32 %v878_v35, %v802_v20  ;;  %v952_v61 = vpop.f32.mrf.mxu1  ;;  %v6100_v0 = vsel %vm381_vm6, %v6099_v18, %v6061_v37 }
 0x1f8   : > { %v1191_v21 = vpop.f32.mrf.mxu0  ;;  %v6230_v6 = vand.u32 4294901760, %v6229_v44  ;;  %v953_v34 = vadd.f32 %v952_v61, %v877_v63 }
 0x1f9   : > { %v954_v51 = vpop.f32.mrf.mxu1 }
 0x1fa   : > { %v6065_v11 = vpop.permute.xlu1 %6064  ;;  %v6231_v41 = vsub.f32 %v6229_v44, %v6230_v6  ;;  %v955_v48 = vadd.f32 %v954_v51, %v879_v31  ;;  %v1031_v52 = vadd.f32 %v1030_v36, %v953_v34  ;;  %v1193_v47 = vpop.f32.mrf.mxu0 }
 0x1fb   : > { %v6101_v5 = vsel %vm383_vm7, %v6100_v0, %v6065_v11 }
 0x1fc   : > { %v6115_v58 = vsel %vm637_vm8, %v6101_v5, 0  ;;  %v6232_v9 = vand.u32 4294901760, %v6231_v41  ;;  %v1033_v49 = vadd.f32 %v1032_v8, %v955_v48  ;;  %v1104_v25 = vpop.f32.mrf.mxu1 }
 0x1fd   : > { %v6152_v13 = vand.u32 4294901760, %v6115_v58  ;;  %v1350_v38 = vpop.f32.mrf.mxu0  ;;  %v1105_v53 = vadd.f32 %v1104_v25, %v1031_v52 }
 0x1fe   : > { %6233 = vmatprep.subr.mxu1 %v6232_v9  ;;  %v1106_v46 = vpop.f32.mrf.mxu1 }
 0x1ff   : > { %v6235_v17 = vsub.f32 %v6115_v58, %v6152_v13  ;;  %6153 = vmatpush1.msra.mxu0 %v6152_v13  ;;  %v1107_v29 = vadd.f32 %v1106_v46, %v1033_v49  ;;  %v1192_v16 = vadd.f32 %v1191_v21, %v1105_v53  ;;  %v1352_v55 = vpop.f32.mrf.mxu0 }
 0x200   : > { %6192 = vmatmul.mubr.f32.vlgmr.msra.gmra.mxu0 %v6191_v56  ;;  %6312 = vmatprep.subr.mxu0 %v6229_v44  ;;  %v1273_v33 = vpop.f32.mrf.mxu1 }
 0x201   : > { %6315 = vmatpush1.msra.mxu0 %v6235_v17  ;;  %6348 = vmatprep.mubr.f32.mxu0 %v6735_v3  ;;  %v6236_v30 = vand.u32 4294901760, %v6235_v17  ;;  %v1194_v15 = vadd.f32 %v1193_v47, %v1107_v29  ;;  %v1274_v27 = vadd.f32 %v1273_v33, %v1192_v16 }
 0x202   : > { %6466 = vmatprep.subr.mxu0 %v6230_v6  ;;  %v1275_v60 = vpop.f32.mrf.mxu1 }
 0x203   : > { %v6237_v39 = vsub.f32 %v6235_v17, %v6236_v30  ;;  %v1276_v19 = vadd.f32 %v1275_v60, %v1194_v15  ;;  %v1351_v50 = vadd.f32 %v1350_v38, %v1274_v27  ;;  %v1504_v32 = vpop.f32.mrf.mxu0 }
 0x204   : > { %6351 = vmatmul.mubr.f32.vlgmr.msra.gmra.mxu0 %v8209_v23  ;;  %v1426_v57 = vpop.f32.mrf.mxu1 }
 0x205   : > { %6470 = vmatpush1.msra.mxu0 %v6236_v30  ;;  %v6238_v40 = vand.u32 4294901760, %v6237_v39  ;;  %6503 = vmatprep.mubr.f32.mxu0 %v6735_v3  ;;  %v1353_v26 = vadd.f32 %v1352_v55, %v1276_v19  ;;  %v1427_v35 = vadd.f32 %v1426_v57, %v1351_v50  ;;  %v1506_v22 = vpop.f32.mrf.mxu0 }
 0x206   : > { %v1428_v28 = vpop.f32.mrf.mxu1 }
 0x207   : > { %6239 = vmatpush1.msra.mxu1 %v6238_v40  ;;  %v1429_v14 = vadd.f32 %v1428_v28, %v1353_v26  ;;  %v1505_v42 = vadd.f32 %v1504_v32, %v1427_v35 }
 0x208   : > { %6274 = vmatmul.mubr.f32.vlgmr.msra.gmra.mxu1 %v8196_v12  ;;  %6388 = vmatprep.subr.mxu1 %v8220_v2  ;;  %v1578_v1 = vpop.f32.mrf.mxu1 }
 0x209   : > { %6390 = vmatpush1.msra.mxu1 %v6152_v13  ;;  %6423 = vmatprep.mubr.f32.mxu1 %v6735_v3  ;;  %v1507_v36 = vadd.f32 %v1506_v22, %v1429_v14  ;;  %v8243_v62 = vadd.f32 %v1578_v1, %v1505_v42 }
 0x20a   : > { %6542 = vmatprep.subr.mxu1 %v8220_v2  ;;  %6505 = vmatmul.mubr.f32.vlgmr.msra.gmra.mxu0 %v8196_v12  ;;  %v1580_v43 = vpop.f32.mrf.mxu1 }
 0x20b   : > { %v8247_v7 = vadd.f32 %v1580_v43, %v1507_v36 }
 0x20c   : > { %6427 = vmatmul.mubr.f32.vlgmr.msra.gmra.mxu1 %v6189_v24 }
 0x20d   : > { %8354 = vst [vmem:[#allocation2_spill] sm:$0xff] %v8247_v7  ;;  %6544 = vmatpush1.msra.mxu1 %v6152_v13  ;;  %6577 = vmatprep.mubr.f32.mxu1 %v6735_v3 }
 0x210   : > { %6579 = vmatmul.mubr.f32.vlgmr.msra.gmra.mxu1 %v8196_v12 }
 0x215   : > { %v1913_v54 = vpop.f32.mrf.mxu0 }
 0x217   : > { %v1915_v8 = vpop.f32.mrf.mxu0 }
 0x219   : > { %v2072_v2 = vpop.f32.mrf.mxu0 }
 0x21b   : > { %v2074_v20 = vpop.f32.mrf.mxu0 }
 0x21d   : > { %v1995_v45 = vpop.f32.mrf.mxu1 }
 0x21e   : > { %v1996_v1 = vadd.f32 %v1995_v45, %v1913_v54 }
 0x21f   : > { %v1997_v37 = vpop.f32.mrf.mxu1 }
 0x220   : > { %v8253_v59 = vpop.f32.mrf.mxu0  ;;  %v1998_v43 = vadd.f32 %v1997_v37, %v1915_v8 }
 0x221   : > { %v8251_v63 = vpop.f32.mrf.mxu1 }
 0x222   : > { %v8257_v23 = vpop.f32.mrf.mxu0 }
 0x223   : > { %v8255_v44 = vpop.f32.mrf.mxu1 }
 0x225   : > { %v8259_v24 = vpop.f32.mrf.mxu1 }
 0x227   : > { %v8261_v3 = vpop.f32.mrf.mxu1 }
 0x231   : > { %v2605_v4 = vpop.f32.mrf.mxu0 }
 0x233   : > { %v2607_v12 = vpop.f32.mrf.mxu0 }
 0x235   : > { %v2764_v31 = vpop.f32.mrf.mxu0 }
 0x237   : > { %v2766_v21 = vpop.f32.mrf.mxu0 }
 0x239   : > { %v2687_v10 = vpop.f32.mrf.mxu1 }
 0x23b   : > { %v2689_v61 = vpop.f32.mrf.mxu1 }
 0x23c   : > { %v8263_v6 = vpop.f32.mrf.mxu0 }
 0x23d   : > { %v2840_v18 = vpop.f32.mrf.mxu1 }
 0x23e   : > { %v8267_v0 = vpop.f32.mrf.mxu0 }
 0x23f   : > { %v8265_v34 = vpop.f32.mrf.mxu1 }
 0x241   : > { %v8269_v11 = vpop.f32.mrf.mxu1 }
 0x243   : > { %v8271_v5 = vpop.f32.mrf.mxu1 }
 0x244   : > { %8355 = vst [vmem:[#allocation3_spill] sm:$0xff] %v8271_v5 }
 0x24d   : > { %v3329_v51 = vpop.f32.mrf.mxu0 }
 0x24f   : > { %v3331_v41 = vpop.f32.mrf.mxu0 }
 0x251   : > { %v3488_v52 = vpop.f32.mrf.mxu0 }
 0x253   : > { %v3490_v58 = vpop.f32.mrf.mxu0 }
 0x255   : > { %v3411_v48 = vpop.f32.mrf.mxu1 }
 0x257   : > { %v3413_v47 = vpop.f32.mrf.mxu1  ;;  %v8273_v13 = vpop.f32.mrf.mxu0 }
 0x258   : > { %v3414_v54 = vadd.f32 %v3413_v47, %v3331_v41 }
 0x259   : > { %v3564_v56 = vpop.f32.mrf.mxu1  ;;  %v8277_v49 = vpop.f32.mrf.mxu0 }
 0x25a   : > { %8356 = vst [vmem:[#allocation4_spill] sm:$0xff] %v8277_v49 }
 0x25b   : > { %v8275_v9 = vpop.f32.mrf.mxu1 }
 0x25d   : > { %v8279_v25 = vpop.f32.mrf.mxu1 }
 0x25e   : > { %8357 = vst [vmem:[#allocation5_spill] sm:$0xff] %v8279_v25  ;;  %v2690_v25 = vadd.f32 %v2689_v61, %v2607_v12 }
 0x25f   : > { %v8281_v53 = vpop.f32.mrf.mxu1 }
 0x260   : > { %8358 = vst [vmem:[#allocation6_spill] sm:$0xff] %v8281_v53  ;;  %v2688_v53 = vadd.f32 %v2687_v10, %v2605_v4  ;;  %v2767_v7 = vadd.f32 %v2766_v21, %v2690_v25  ;;  %v3491_v10 = vadd.f32 %v3490_v58, %v3414_v54 }
 0x262   : > { %v2765_v5 = vadd.f32 %v2764_v31, %v2688_v53  ;;  %v2843_v12 = vadd.f32 %v8265_v34, %v2767_v7 }
 0x269   : > { %v4053_v38 = vpop.f32.mrf.mxu0 }
 0x26b   : > { %v4055_v17 = vpop.f32.mrf.mxu0 }
 0x26d   : > { %v4212_v29 = vpop.f32.mrf.mxu0 }
 0x26f   : > { %v4214_v30 = vpop.f32.mrf.mxu0 }
 0x271   : > { %v4135_v46 = vpop.f32.mrf.mxu1 }
 0x272   : > { %v4136_v4 = vadd.f32 %v4135_v46, %v4053_v38  ;;  %v8368_v46 = vld [vmem:[#allocation2_spill] sm:$0xff] }
 0x273   : > { %v4137_v16 = vpop.f32.mrf.mxu1  ;;  %v8285_v55 = vpop.f32.mrf.mxu0 }
 0x274   : > { %8359 = vst [vmem:[#allocation7_spill] sm:$0xff] %v8285_v55  ;;  %v2075_v55 = vadd.f32 %v2074_v20, %v1998_v43  ;;  %v4138_v61 = vadd.f32 %v4137_v16, %v4055_v17  ;;  %v8370_v16 = vld [vmem:[#allocation4_spill] sm:$0xff] }
 0x275   : > { %v8283_v33 = vpop.f32.mrf.mxu1  ;;  %v8289_v27 = vpop.f32.mrf.mxu0 }
 0x276   : > { %8361 = vst [vmem:[#allocation9_spill] sm:$0xff] %v8289_v27  ;;  %v2073_v27 = vadd.f32 %v2072_v2, %v1996_v1  ;;  %v2841_v2 = vadd.f32 %v2840_v18, %v2765_v5  ;;  %v2921_v5 = vadd.f32 %v8267_v0, %v2843_v12  ;;  %v4215_v7 = vadd.f32 %v4214_v30, %v4138_v61 }
 0x277   : > { %v8287_v15 = vpop.f32.mrf.mxu1 }
 0x278   : > { %8360 = vst [vmem:[#allocation8_spill] sm:$0xff] %v8287_v15  ;;  %v2919_v21 = vadd.f32 %v8263_v6, %v2841_v2 }
 0x279   : > { %v8291_v60 = vpop.f32.mrf.mxu1 }
 0x27a   : > { %8362 = vst [vmem:[#allocation10_spill] sm:$0xff] %v8291_v60 }
 0x27b   : > { %v8293_v50 = vpop.f32.mrf.mxu1 }
 0x27c   : > { %8363 = vst [vmem:[#allocation11_spill] sm:$0xff] %v8293_v50 }
 0x288   : > { %v4745_v39 = vpop.f32.mrf.mxu0 }
 0x28a   : > { %v4747_v19 = vpop.f32.mrf.mxu0 }
 0x28c   : > { %v4904_v57 = vpop.f32.mrf.mxu0 }
 0x28e   : > { %v4906_v26 = vpop.f32.mrf.mxu0 }
 0x290   : > { %v4827_v40 = vpop.f32.mrf.mxu1 }
 0x292   : > { %v4829_v32 = vpop.f32.mrf.mxu1  ;;  %v8295_v28 = vpop.f32.mrf.mxu0 }
 0x293   : > { %8364 = vst [vmem:[#allocation12_spill] sm:$0xff] %v8295_v28  ;;  %v2149_v28 = vadd.f32 %v8251_v63, %v2073_v27  ;;  %v4830_v47 = vadd.f32 %v4829_v32, %v4747_v19  ;;  %v8372_v19 = vld [vmem:[#allocation5_spill] sm:$0xff] }
 0x294   : > { %v4980_v35 = vpop.f32.mrf.mxu1  ;;  %v8299_v42 = vpop.f32.mrf.mxu0 }
 0x295   : > { %8366 = vst [vmem:[#allocation14_spill] sm:$0xff] %v8299_v42  ;;  %v2151_v42 = vadd.f32 %v8255_v44, %v2075_v55  ;;  %v2227_v8 = vadd.f32 %v8253_v59, %v2149_v28  ;;  %v4907_v17 = vadd.f32 %v4906_v26, %v4830_v47  ;;  %v8371_v55 = vld [vmem:[#allocation8_spill] sm:$0xff] }
 0x296   : > { %v8297_v14 = vpop.f32.mrf.mxu1 }
 0x297   : > { %8365 = vst [vmem:[#allocation13_spill] sm:$0xff] %v8297_v14  ;;  %v3412_v14 = vadd.f32 %v3411_v48, %v3329_v51  ;;  %v2229_v20 = vadd.f32 %v8257_v23, %v2151_v42  ;;  %v4828_v51 = vadd.f32 %v4827_v40, %v4745_v39  ;;  %v2301_v44 = vadd.f32 %v8259_v24, %v2227_v8  ;;  %v8373_v40 = vld [vmem:[#allocation7_spill] sm:$0xff] }
 0x298   : > { %v8301_v36 = vpop.f32.mrf.mxu1  ;;  %v4213_v48 = vadd.f32 %v4212_v29, %v4136_v4  ;;  %v3567_v23 = vadd.f32 %v8275_v9, %v3491_v10  ;;  %v2993_v24 = vadd.f32 %v8269_v11, %v2919_v21  ;;  %v8369_v29 = vld [vmem:[#allocation3_spill] sm:$0xff] }
 0x299   : > { %8367 = vst [vmem:[#allocation15_spill] sm:$0xff] %v8301_v36  ;;  %v3489_v37 = vadd.f32 %v3488_v52, %v3412_v14  ;;  %v2303_v18 = vadd.f32 %v8261_v3, %v2229_v20  ;;  %v4905_v58 = vadd.f32 %v4904_v57, %v4828_v51  ;;  %v2305_v38 = vadd.f32 %v2301_v44, %v8243_v62  ;;  %v8375_v14 = vld [vmem:[#allocation6_spill] sm:$0xff] }
 0x29a   : > { %v8303_v50 = vpop.f32.mrf.mxu1  ;;  %v2995_v9 = vadd.f32 %v8369_v29, %v2921_v5  ;;  %v3645_v30 = vadd.f32 %v8370_v16, %v3567_v23  ;;  %v8377_v54 = vld [vmem:[#allocation12_spill] sm:$0xff] }
 0x29b   : > { %v3565_v41 = vadd.f32 %v3564_v56, %v3489_v37  ;;  %v4289_v56 = vadd.f32 %v8283_v33, %v4213_v48  ;;  %v2306_v0 = vadd.f32 %v2303_v18, %v8368_v46  ;;  %v4981_v62 = vadd.f32 %v4980_v35, %v4905_v58 }
 0x29c   : > { %v2997_v11 = vadd.f32 %v2993_v24, %v2305_v38  ;;  %v3719_v42 = vadd.f32 %v8375_v14, %v3645_v30  ;;  %v8379_v20 = vld [vmem:[#allocation14_spill] sm:$0xff]  ;;  %v6591_v30 = vpop.permute.xlu0 %6590 }
 0x29d   : > { %v3643_v6 = vadd.f32 %v8273_v13, %v3565_v41  ;;  %v4367_v33 = vadd.f32 %v8373_v40, %v4289_v56  ;;  %v2998_v28 = vadd.f32 %v2995_v9, %v2306_v0 }
 0x29e   : > { %v8374_v32 = vld [vmem:[#allocation13_spill] sm:$0xff] }
 0x29f   : > { %v3717_v13 = vadd.f32 %v8372_v19, %v3643_v6  ;;  %v3722_v51 = vadd.f32 %v3719_v42, %v2998_v28 }
 0x2a0   : > { %v8381_v41 = vld [vmem:[#allocation15_spill] sm:$0xff] }
 0x2a1   : > { %v3721_v35 = vadd.f32 %v3717_v13, %v2997_v11 }
 0x2a4   : > { %v5469_v22 = vpop.f32.mrf.mxu0 }
 0x2a6   : > { %v5471_v60 = vpop.f32.mrf.mxu0 }
 0x2a8   : > { %v5628_v49 = vpop.f32.mrf.mxu0 }
 0x2aa   : > { %v5630_v36 = vpop.f32.mrf.mxu0 }
 0x2ac   : > { %v5551_v15 = vpop.f32.mrf.mxu1 }
 0x2ad   : > { %v5552_v59 = vadd.f32 %v5551_v15, %v5469_v22  ;;  %v4291_v15 = vadd.f32 %v8371_v55, %v4215_v7  ;;  %v8376_v22 = vld [vmem:[#allocation9_spill] sm:$0xff] }
 0x2ae   : > { %v5553_v45 = vpop.f32.mrf.mxu1  ;;  %v5782_v31 = vpop.f32.mrf.mxu0 }
 0x2af   : > { %v5554_v25 = vadd.f32 %v5553_v45, %v5471_v60  ;;  %v5629_v3 = vadd.f32 %v5628_v49, %v5552_v59  ;;  %v4983_v49 = vadd.f32 %v8374_v32, %v4907_v17  ;;  %v4369_v1 = vadd.f32 %v8376_v22, %v4291_v15 }
 0x2b0   : > { %v5704_v63 = vpop.f32.mrf.mxu1  ;;  %v5784_v52 = vpop.f32.mrf.mxu0  ;;  %v5059_v45 = vadd.f32 %v8377_v54, %v4981_v62 }
 0x2b1   : > { %v5631_v60 = vadd.f32 %v5630_v36, %v5554_v25  ;;  %v5705_v26 = vadd.f32 %v5704_v63, %v5629_v3  ;;  %v8378_v36 = vld [vmem:[#allocation10_spill] sm:$0xff]  ;;  %v5061_v12 = vadd.f32 %v8379_v20, %v4983_v49  ;;  %v8380_v63 = vld [vmem:[#allocation11_spill] sm:$0xff] }
 0x2b2   : > { %v5706_v34 = vpop.f32.mrf.mxu1  ;;  %v4441_v2 = vadd.f32 %v8378_v36, %v4367_v33  ;;  %v4443_v44 = vadd.f32 %v8380_v63, %v4369_v1  ;;  %v5133_v48 = vadd.f32 %v8381_v41, %v5059_v45 }
 0x2b3   : > { %v5707_v8 = vadd.f32 %v5706_v34, %v5631_v60  ;;  %v5783_v10 = vadd.f32 %v5782_v31, %v5705_v26  ;;  %v5135_v34 = vadd.f32 %v8303_v50, %v5061_v12 }
 0x2b4   : > { %v5856_v27 = vpop.f32.mrf.mxu1  ;;  %v4445_v5 = vadd.f32 %v4441_v2, %v3721_v35  ;;  %v4446_v24 = vadd.f32 %v4443_v44, %v3722_v51 }
 0x2b5   : > { %v5785_v47 = vadd.f32 %v5784_v52, %v5707_v8  ;;  %v5857_v58 = vadd.f32 %v5856_v27, %v5783_v10 }
 0x2b6   : > { %v5858_v43 = vpop.f32.mrf.mxu1  ;;  %v5137_v6 = vadd.f32 %v5133_v48, %v4445_v5  ;;  %v5138_v52 = vadd.f32 %v5135_v34, %v4446_v24 }
 0x2b7   : > { %v5859_v56 = vadd.f32 %v5858_v43, %v5785_v47 }
 0x2b8   : > { %v5861_v0 = vadd.f32 %v5857_v58, %v5137_v6 }
 0x2b9   : > { %v5862_v55 = vadd.f32 %v5859_v56, %v5138_v52 }
 0x2c0   : > { %v6193_v53 = vpop.f32.mrf.mxu0 }
 0x2c2   : > { %v6195_v39 = vpop.f32.mrf.mxu0 }
 0x2c4   : > { %v6352_v57 = vpop.f32.mrf.mxu0 }
 0x2c6   : > { %v6354_v4 = vpop.f32.mrf.mxu0 }
 0x2c8   : > { %v6275_v37 = vpop.f32.mrf.mxu1 }
 0x2c9   : > { %v6276_v61 = vadd.f32 %v6275_v37, %v6193_v53 }
 0x2ca   : > { %v6277_v21 = vpop.f32.mrf.mxu1  ;;  %v6506_v7 = vpop.f32.mrf.mxu0 }
 0x2cb   : > { %v6278_v59 = vadd.f32 %v6277_v21, %v6195_v39  ;;  %v6353_v18 = vadd.f32 %v6352_v57, %v6276_v61 }
 0x2cc   : > { %v6428_v23 = vpop.f32.mrf.mxu1  ;;  %v6508_v3 = vpop.f32.mrf.mxu0 }
 0x2cd   : > { %v6355_v25 = vadd.f32 %v6354_v4, %v6278_v59  ;;  %v6429_v38 = vadd.f32 %v6428_v23, %v6353_v18 }
 0x2ce   : > { %v6430_v31 = vpop.f32.mrf.mxu1 }
 0x2cf   : > { %v6431_v53 = vadd.f32 %v6430_v31, %v6355_v25  ;;  %v6507_v17 = vadd.f32 %v6506_v7, %v6429_v38 }
 0x2d0   : > { %v6580_v46 = vpop.f32.mrf.mxu1 }
 0x2d1   : > { %v6509_v29 = vadd.f32 %v6508_v3, %v6431_v53  ;;  %v6581_v9 = vadd.f32 %v6580_v46, %v6507_v17 }
 0x2d2   : > { %v6582_v16 = vpop.f32.mrf.mxu1 }
 0x2d3   : > { %v6583_v50 = vadd.f32 %v6582_v16, %v6509_v29  ;;  %v6585_v15 = vadd.f32 %v6581_v9, %v5861_v0 }
 0x2d5   : > { %v6586_v27 = vadd.f32 %v6583_v50, %v5862_v55  ;;  %v6593_v39 = vadd.f32 %v6591_v30, %v6585_v15 }
 0x2d7   : > { %v6594_v62 = vadd.f32 %v6591_v30, %v6586_v27  ;;  %vm6595_vm9 = vcmp.ge.f32.partialorder %v6593_v39, 0.0  ;;  %v6597_v60 = vmul.f32 0.1, %v6593_v39 }
 0x2d9   : > { %vm6596_vm10 = vcmp.ge.f32.partialorder %v6594_v62, 0.0  ;;  %v6598_v11 = vmul.f32 0.1, %v6594_v62  ;;  %v6599_v19 = vsel %vm6595_vm9, %v6593_v39, %v6597_v60 }
 0x2da   : > { %6601 = vst [vmem:[%s170_s25] sm:$0xff] %v6599_v19 }
 0x2db   : > { %v6600_v13 = vsel %vm6596_vm10, %v6594_v62, %v6598_v11 }
 0x2dc   : > { %6602 = vst [vmem:[%s170_s25 + $0x8] sm:$0xff] %v6600_v13 }
 0x2dd PF: > { %s13_s12 = sadd.s32 1, %s6732_s12  }
 0x2de   : > { %p10_p4 = scmp.ge.s32.totalorder %s13_s12, 4  }
 0x2e0   :  { %12 = sbr.rel (!%p10_p4) target bundleno = 1 (0x1), region = 70 }

</bundles_post_ra>
